<compile_context>
chip_gen: v7x
topology: tpu7x:2x2x1
jax: 0.10.0
libtpu: 0.0.40
codegen_flags: <defaults>
</compile_context>

<pallas_src>
import jax
import jax.numpy as jnp
from jax.experimental import pallas as pl
from jax.experimental.pallas import tpu as pltpu


def _fused_conv1x1_kernel(x_ref, wb_ref, o_ref):
    # x_ref : (N, Cin, Hp, Wp)  f32 VMEM -- spatially zero-padded input
    # wb_ref: (Cout, Cin + 1)   f32 SMEM -- [:, :Cin] conv weight, [:, Cin] bias + v2
    # o_ref : (N, Cout, Hp, Wp) f32 VMEM -- final module output (NCHW, padded)
    n_tot, cin, hp, wp = x_ref.shape
    cout = o_ref.shape[1]
    inv6 = jnp.float32(1.0 / 6.0)

    for n in range(n_tot):
        # Load each input-channel plane of this batch element once.
        xs = [x_ref[n, c] for c in range(cin)]          # each (Hp, Wp)
        for co in range(cout):
            # 1x1 conv == per-pixel linear combination of channels (VPU FMAs,
            # scalar weights broadcast from SMEM).
            acc = xs[0] * wb_ref[co, 0]
            for c in range(1, cin):
                acc = acc + xs[c] * wb_ref[co, c]
            # + (bias + v2), clamp(0, 6), / 6.  Border pixels (zero-padded
            # input) come out as clip(bias + v2, 0, 6) / 6 automatically.
            y = jnp.clip(acc + wb_ref[co, cin], 0.0, 6.0) * inv6
            o_ref[n, co] = y.astype(o_ref.dtype)


def fused_conv1x1_relu6(x_nchw, weight, bias, v2):
    """Conv2d(Cin, Cout, 1, stride=1, padding=1) + add(v2) + clamp(0, 6) + /6."""
    N, Cin, H, W = x_nchw.shape
    Cout = weight.shape[0]
    Hp, Wp = H + 2, W + 2

    # Only remaining wrapper data op: a tiny spatial zero-pad of the input so
    # the kernel computes the padding=1 border literally and every store is an
    # aligned whole-plane store.
    x_pad = jnp.pad(x_nchw.astype(jnp.float32),
                    ((0, 0), (0, 0), (1, 1), (1, 1)))

    # Single merged parameter operand: conv weight and (bias + v2) per channel.
    w_mat = weight.reshape(Cout, Cin).astype(jnp.float32)
    b_comb = (bias.reshape(Cout) + v2.reshape(Cout)).astype(jnp.float32)
    wb = jnp.concatenate([w_mat, b_comb[:, None]], axis=1)      # (Cout, Cin + 1)

    return pl.pallas_call(
        _fused_conv1x1_kernel,
        out_shape=jax.ShapeDtypeStruct((N, Cout, Hp, Wp), jnp.float32),
        in_specs=[
            pl.BlockSpec(memory_space=pltpu.MemorySpace.VMEM),
            pl.BlockSpec(memory_space=pltpu.MemorySpace.SMEM),
        ],
        out_specs=pl.BlockSpec(memory_space=pltpu.MemorySpace.VMEM),
    )(x_pad, wb)


def reference(x_nchw, weight, bias, v2):
    # pure-JAX reference of the same semantics as the PyTorch module
    Cout, Cin = weight.shape[0], weight.shape[1]
    x_pad = jnp.pad(x_nchw, ((0, 0), (0, 0), (1, 1), (1, 1)))
    y = jnp.einsum('nchw,oc->nohw', x_pad, weight.reshape(Cout, Cin))
    y = y + bias.reshape(1, Cout, 1, 1) + v2
    return jnp.clip(y, 0.0, 6.0) / 6.0


if __name__ == "__main__":
    key = jax.random.PRNGKey(0)
    k_x, k_w, k_b, k_v2 = jax.random.split(key, 4)

    # small shapes consistent with the module: batch=2, Cin=3, Cout=8, spatial=16
    N, Cin, Cout, H, W = 2, 3, 8, 16, 16
    x1 = jax.random.normal(k_x, (N, Cin, H, W), dtype=jnp.float32)

    # deterministic parameter init (Conv2d(3, 8, 1))
    fan_in = Cin * 1 * 1
    bound = 1.0 / (fan_in ** 0.5)
    weight = jax.random.uniform(k_w, (Cout, Cin, 1, 1), jnp.float32, -bound, bound)
    bias = jax.random.uniform(k_b, (Cout,), jnp.float32, -bound, bound)

    # TODO(synk): original `torch.Tensor(6).uniform_(2.3, 0.5, [1,8,1,1])` is an
    # invalid PyTorch call; interpreted as a per-channel (1,8,1,1) tensor drawn
    # uniformly from [0.5, 2.3].
    v2 = jax.random.uniform(k_v2, (1, Cout, 1, 1), jnp.float32, 0.5, 2.3)

    out = fused_conv1x1_relu6(x1, weight, bias, v2)
    out = jax.block_until_ready(out)

    ref = reference(x1, weight, bias, v2)
    assert out.shape == (N, Cout, H + 2, W + 2), out.shape
    assert jnp.allclose(out, ref, atol=1e-5, rtol=1e-5)
    print("KERNEL_OK")
</pallas_src>

<mosaic_0001>
module attributes {stable_mosaic.version = 11 : i64} {
  func.func @_fused_conv1x1_kernel(%arg0: memref<2x3x18x18xf32, #tpu.memory_space<vmem>>, %arg1: memref<8x4xf32, #tpu.memory_space<smem>>, %arg2: memref<2x8x18x18xf32, #tpu.memory_space<vmem>>) attributes {dimension_semantics = [], scalar_prefetch = 0 : i64, scratch_operands = 0 : i64, tpu.core_type = #tpu.core_type<tc>} {
    %c0 = arith.constant 0 : index
    %c0_0 = arith.constant 0 : index
    %c0_1 = arith.constant 0 : index
    %c0_2 = arith.constant 0 : index
    %0 = vector.load %arg0[%c0, %c0_0, %c0_1, %c0_2] : memref<2x3x18x18xf32, #tpu.memory_space<vmem>>, vector<1x1x18x18xf32>
    %1 = vector.shape_cast %0 : vector<1x1x18x18xf32> to vector<18x18xf32>
    %c0_3 = arith.constant 0 : index
    %c1 = arith.constant 1 : index
    %c0_4 = arith.constant 0 : index
    %c0_5 = arith.constant 0 : index
    %2 = vector.load %arg0[%c0_3, %c1, %c0_4, %c0_5] : memref<2x3x18x18xf32, #tpu.memory_space<vmem>>, vector<1x1x18x18xf32>
    %3 = vector.shape_cast %2 : vector<1x1x18x18xf32> to vector<18x18xf32>
    %c0_6 = arith.constant 0 : index
    %c2 = arith.constant 2 : index
    %c0_7 = arith.constant 0 : index
    %c0_8 = arith.constant 0 : index
    %4 = vector.load %arg0[%c0_6, %c2, %c0_7, %c0_8] : memref<2x3x18x18xf32, #tpu.memory_space<vmem>>, vector<1x1x18x18xf32>
    %5 = vector.shape_cast %4 : vector<1x1x18x18xf32> to vector<18x18xf32>
    %c0_9 = arith.constant 0 : index
    %c0_10 = arith.constant 0 : index
    %6 = memref.load %arg1[%c0_9, %c0_10] : memref<8x4xf32, #tpu.memory_space<smem>>
    %7 = vector.broadcast %6 : f32 to vector<18x18xf32>
    %8 = arith.mulf %1, %7 : vector<18x18xf32>
    %c0_11 = arith.constant 0 : index
    %c1_12 = arith.constant 1 : index
    %9 = memref.load %arg1[%c0_11, %c1_12] : memref<8x4xf32, #tpu.memory_space<smem>>
    %10 = vector.broadcast %9 : f32 to vector<18x18xf32>
    %11 = arith.mulf %3, %10 : vector<18x18xf32>
    %12 = arith.addf %8, %11 : vector<18x18xf32>
    %c0_13 = arith.constant 0 : index
    %c2_14 = arith.constant 2 : index
    %13 = memref.load %arg1[%c0_13, %c2_14] : memref<8x4xf32, #tpu.memory_space<smem>>
    %14 = vector.broadcast %13 : f32 to vector<18x18xf32>
    %15 = arith.mulf %5, %14 : vector<18x18xf32>
    %16 = arith.addf %12, %15 : vector<18x18xf32>
    %c0_15 = arith.constant 0 : index
    %c3 = arith.constant 3 : index
    %17 = memref.load %arg1[%c0_15, %c3] : memref<8x4xf32, #tpu.memory_space<smem>>
    %18 = vector.broadcast %17 : f32 to vector<18x18xf32>
    %19 = arith.addf %16, %18 : vector<18x18xf32>
    %cst = arith.constant 0.000000e+00 : f32
    %cst_16 = arith.constant 6.000000e+00 : f32
    %20 = vector.broadcast %cst : f32 to vector<18x18xf32>
    %21 = arith.maximumf %20, %19 : vector<18x18xf32>
    %22 = vector.broadcast %cst_16 : f32 to vector<18x18xf32>
    %23 = arith.minimumf %22, %21 : vector<18x18xf32>
    %cst_17 = arith.constant 0.166666672 : f32
    %24 = vector.broadcast %cst_17 : f32 to vector<18x18xf32>
    %25 = arith.mulf %23, %24 : vector<18x18xf32>
    %c0_18 = arith.constant 0 : index
    %c0_19 = arith.constant 0 : index
    %c0_20 = arith.constant 0 : index
    %c0_21 = arith.constant 0 : index
    %26 = vector.load %arg2[%c0_18, %c0_19, %c0_20, %c0_21] : memref<2x8x18x18xf32, #tpu.memory_space<vmem>>, vector<1x1x18x18xf32>
    %27 = vector.shape_cast %26 : vector<1x1x18x18xf32> to vector<18x18xf32>
    %28 = vector.shape_cast %25 : vector<18x18xf32> to vector<1x1x18x18xf32>
    tpu.vector_store %arg2[%c0_18, %c0_19, %c0_20, %c0_21], %28 {strides = array<i32>} : memref<2x8x18x18xf32, #tpu.memory_space<vmem>>, vector<1x1x18x18xf32>,
    %c1_22 = arith.constant 1 : index
    %c0_23 = arith.constant 0 : index
    %29 = memref.load %arg1[%c1_22, %c0_23] : memref<8x4xf32, #tpu.memory_space<smem>>
    %30 = vector.broadcast %29 : f32 to vector<18x18xf32>
    %31 = arith.mulf %1, %30 : vector<18x18xf32>
    %c1_24 = arith.constant 1 : index
    %c1_25 = arith.constant 1 : index
    %32 = memref.load %arg1[%c1_24, %c1_25] : memref<8x4xf32, #tpu.memory_space<smem>>
    %33 = vector.broadcast %32 : f32 to vector<18x18xf32>
    %34 = arith.mulf %3, %33 : vector<18x18xf32>
    %35 = arith.addf %31, %34 : vector<18x18xf32>
    %c1_26 = arith.constant 1 : index
    %c2_27 = arith.constant 2 : index
    %36 = memref.load %arg1[%c1_26, %c2_27] : memref<8x4xf32, #tpu.memory_space<smem>>
    %37 = vector.broadcast %36 : f32 to vector<18x18xf32>
    %38 = arith.mulf %5, %37 : vector<18x18xf32>
    %39 = arith.addf %35, %38 : vector<18x18xf32>
    %c1_28 = arith.constant 1 : index
    %c3_29 = arith.constant 3 : index
    %40 = memref.load %arg1[%c1_28, %c3_29] : memref<8x4xf32, #tpu.memory_space<smem>>
    %41 = vector.broadcast %40 : f32 to vector<18x18xf32>
    %42 = arith.addf %39, %41 : vector<18x18xf32>
    %cst_30 = arith.constant 0.000000e+00 : f32
    %cst_31 = arith.constant 6.000000e+00 : f32
    %43 = vector.broadcast %cst_30 : f32 to vector<18x18xf32>
    %44 = arith.maximumf %43, %42 : vector<18x18xf32>
    %45 = vector.broadcast %cst_31 : f32 to vector<18x18xf32>
    %46 = arith.minimumf %45, %44 : vector<18x18xf32>
    %cst_32 = arith.constant 0.166666672 : f32
    %47 = vector.broadcast %cst_32 : f32 to vector<18x18xf32>
    %48 = arith.mulf %46, %47 : vector<18x18xf32>
    %c0_33 = arith.constant 0 : index
    %c1_34 = arith.constant 1 : index
    %c0_35 = arith.constant 0 : index
    %c0_36 = arith.constant 0 : index
    %49 = vector.load %arg2[%c0_33, %c1_34, %c0_35, %c0_36] : memref<2x8x18x18xf32, #tpu.memory_space<vmem>>, vector<1x1x18x18xf32>
    %50 = vector.shape_cast %49 : vector<1x1x18x18xf32> to vector<18x18xf32>
    %51 = vector.shape_cast %48 : vector<18x18xf32> to vector<1x1x18x18xf32>
    tpu.vector_store %arg2[%c0_33, %c1_34, %c0_35, %c0_36], %51 {strides = array<i32>} : memref<2x8x18x18xf32, #tpu.memory_space<vmem>>, vector<1x1x18x18xf32>,
    %c2_37 = arith.constant 2 : index
    %c0_38 = arith.constant 0 : index
    %52 = memref.load %arg1[%c2_37, %c0_38] : memref<8x4xf32, #tpu.memory_space<smem>>
    %53 = vector.broadcast %52 : f32 to vector<18x18xf32>
    %54 = arith.mulf %1, %53 : vector<18x18xf32>
    %c2_39 = arith.constant 2 : index
    %c1_40 = arith.constant 1 : index
    %55 = memref.load %arg1[%c2_39, %c1_40] : memref<8x4xf32, #tpu.memory_space<smem>>
    %56 = vector.broadcast %55 : f32 to vector<18x18xf32>
    %57 = arith.mulf %3, %56 : vector<18x18xf32>
    %58 = arith.addf %54, %57 : vector<18x18xf32>
    %c2_41 = arith.constant 2 : index
    %c2_42 = arith.constant 2 : index
    %59 = memref.load %arg1[%c2_41, %c2_42] : memref<8x4xf32, #tpu.memory_space<smem>>
    %60 = vector.broadcast %59 : f32 to vector<18x18xf32>
    %61 = arith.mulf %5, %60 : vector<18x18xf32>
    %62 = arith.addf %58, %61 : vector<18x18xf32>
    %c2_43 = arith.constant 2 : index
    %c3_44 = arith.constant 3 : index
    %63 = memref.load %arg1[%c2_43, %c3_44] : memref<8x4xf32, #tpu.memory_space<smem>>
    %64 = vector.broadcast %63 : f32 to vector<18x18xf32>
    %65 = arith.addf %62, %64 : vector<18x18xf32>
    %cst_45 = arith.constant 0.000000e+00 : f32
    %cst_46 = arith.constant 6.000000e+00 : f32
    %66 = vector.broadcast %cst_45 : f32 to vector<18x18xf32>
    %67 = arith.maximumf %66, %65 : vector<18x18xf32>
    %68 = vector.broadcast %cst_46 : f32 to vector<18x18xf32>
    %69 = arith.minimumf %68, %67 : vector<18x18xf32>
    %cst_47 = arith.constant 0.166666672 : f32
    %70 = vector.broadcast %cst_47 : f32 to vector<18x18xf32>
    %71 = arith.mulf %69, %70 : vector<18x18xf32>
    %c0_48 = arith.constant 0 : index
    %c2_49 = arith.constant 2 : index
    %c0_50 = arith.constant 0 : index
    %c0_51 = arith.constant 0 : index
    %72 = vector.load %arg2[%c0_48, %c2_49, %c0_50, %c0_51] : memref<2x8x18x18xf32, #tpu.memory_space<vmem>>, vector<1x1x18x18xf32>
    %73 = vector.shape_cast %72 : vector<1x1x18x18xf32> to vector<18x18xf32>
    %74 = vector.shape_cast %71 : vector<18x18xf32> to vector<1x1x18x18xf32>
    tpu.vector_store %arg2[%c0_48, %c2_49, %c0_50, %c0_51], %74 {strides = array<i32>} : memref<2x8x18x18xf32, #tpu.memory_space<vmem>>, vector<1x1x18x18xf32>,
    %c3_52 = arith.constant 3 : index
    %c0_53 = arith.constant 0 : index
    %75 = memref.load %arg1[%c3_52, %c0_53] : memref<8x4xf32, #tpu.memory_space<smem>>
    %76 = vector.broadcast %75 : f32 to vector<18x18xf32>
    %77 = arith.mulf %1, %76 : vector<18x18xf32>
    %c3_54 = arith.constant 3 : index
    %c1_55 = arith.constant 1 : index
    %78 = memref.load %arg1[%c3_54, %c1_55] : memref<8x4xf32, #tpu.memory_space<smem>>
    %79 = vector.broadcast %78 : f32 to vector<18x18xf32>
    %80 = arith.mulf %3, %79 : vector<18x18xf32>
    %81 = arith.addf %77, %80 : vector<18x18xf32>
    %c3_56 = arith.constant 3 : index
    %c2_57 = arith.constant 2 : index
    %82 = memref.load %arg1[%c3_56, %c2_57] : memref<8x4xf32, #tpu.memory_space<smem>>
    %83 = vector.broadcast %82 : f32 to vector<18x18xf32>
    %84 = arith.mulf %5, %83 : vector<18x18xf32>
    %85 = arith.addf %81, %84 : vector<18x18xf32>
    %c3_58 = arith.constant 3 : index
    %c3_59 = arith.constant 3 : index
    %86 = memref.load %arg1[%c3_58, %c3_59] : memref<8x4xf32, #tpu.memory_space<smem>>
    %87 = vector.broadcast %86 : f32 to vector<18x18xf32>
    %88 = arith.addf %85, %87 : vector<18x18xf32>
    %cst_60 = arith.constant 0.000000e+00 : f32
    %cst_61 = arith.constant 6.000000e+00 : f32
    %89 = vector.broadcast %cst_60 : f32 to vector<18x18xf32>
    %90 = arith.maximumf %89, %88 : vector<18x18xf32>
    %91 = vector.broadcast %cst_61 : f32 to vector<18x18xf32>
    %92 = arith.minimumf %91, %90 : vector<18x18xf32>
    %cst_62 = arith.constant 0.166666672 : f32
    %93 = vector.broadcast %cst_62 : f32 to vector<18x18xf32>
    %94 = arith.mulf %92, %93 : vector<18x18xf32>
    %c0_63 = arith.constant 0 : index
    %c3_64 = arith.constant 3 : index
    %c0_65 = arith.constant 0 : index
    %c0_66 = arith.constant 0 : index
    %95 = vector.load %arg2[%c0_63, %c3_64, %c0_65, %c0_66] : memref<2x8x18x18xf32, #tpu.memory_space<vmem>>, vector<1x1x18x18xf32>
    %96 = vector.shape_cast %95 : vector<1x1x18x18xf32> to vector<18x18xf32>
    %97 = vector.shape_cast %94 : vector<18x18xf32> to vector<1x1x18x18xf32>
    tpu.vector_store %arg2[%c0_63, %c3_64, %c0_65, %c0_66], %97 {strides = array<i32>} : memref<2x8x18x18xf32, #tpu.memory_space<vmem>>, vector<1x1x18x18xf32>,
    %c4 = arith.constant 4 : index
    %c0_67 = arith.constant 0 : index
    %98 = memref.load %arg1[%c4, %c0_67] : memref<8x4xf32, #tpu.memory_space<smem>>
    %99 = vector.broadcast %98 : f32 to vector<18x18xf32>
    %100 = arith.mulf %1, %99 : vector<18x18xf32>
    %c4_68 = arith.constant 4 : index
    %c1_69 = arith.constant 1 : index
    %101 = memref.load %arg1[%c4_68, %c1_69] : memref<8x4xf32, #tpu.memory_space<smem>>
    %102 = vector.broadcast %101 : f32 to vector<18x18xf32>
    %103 = arith.mulf %3, %102 : vector<18x18xf32>
    %104 = arith.addf %100, %103 : vector<18x18xf32>
    %c4_70 = arith.constant 4 : index
    %c2_71 = arith.constant 2 : index
    %105 = memref.load %arg1[%c4_70, %c2_71] : memref<8x4xf32, #tpu.memory_space<smem>>
    %106 = vector.broadcast %105 : f32 to vector<18x18xf32>
    %107 = arith.mulf %5, %106 : vector<18x18xf32>
    %108 = arith.addf %104, %107 : vector<18x18xf32>
    %c4_72 = arith.constant 4 : index
    %c3_73 = arith.constant 3 : index
    %109 = memref.load %arg1[%c4_72, %c3_73] : memref<8x4xf32, #tpu.memory_space<smem>>
    %110 = vector.broadcast %109 : f32 to vector<18x18xf32>
    %111 = arith.addf %108, %110 : vector<18x18xf32>
    %cst_74 = arith.constant 0.000000e+00 : f32
    %cst_75 = arith.constant 6.000000e+00 : f32
    %112 = vector.broadcast %cst_74 : f32 to vector<18x18xf32>
    %113 = arith.maximumf %112, %111 : vector<18x18xf32>
    %114 = vector.broadcast %cst_75 : f32 to vector<18x18xf32>
    %115 = arith.minimumf %114, %113 : vector<18x18xf32>
    %cst_76 = arith.constant 0.166666672 : f32
    %116 = vector.broadcast %cst_76 : f32 to vector<18x18xf32>
    %117 = arith.mulf %115, %116 : vector<18x18xf32>
    %c0_77 = arith.constant 0 : index
    %c4_78 = arith.constant 4 : index
    %c0_79 = arith.constant 0 : index
    %c0_80 = arith.constant 0 : index
    %118 = vector.load %arg2[%c0_77, %c4_78, %c0_79, %c0_80] : memref<2x8x18x18xf32, #tpu.memory_space<vmem>>, vector<1x1x18x18xf32>
    %119 = vector.shape_cast %118 : vector<1x1x18x18xf32> to vector<18x18xf32>
    %120 = vector.shape_cast %117 : vector<18x18xf32> to vector<1x1x18x18xf32>
    tpu.vector_store %arg2[%c0_77, %c4_78, %c0_79, %c0_80], %120 {strides = array<i32>} : memref<2x8x18x18xf32, #tpu.memory_space<vmem>>, vector<1x1x18x18xf32>,
    %c5 = arith.constant 5 : index
    %c0_81 = arith.constant 0 : index
    %121 = memref.load %arg1[%c5, %c0_81] : memref<8x4xf32, #tpu.memory_space<smem>>
    %122 = vector.broadcast %121 : f32 to vector<18x18xf32>
    %123 = arith.mulf %1, %122 : vector<18x18xf32>
    %c5_82 = arith.constant 5 : index
    %c1_83 = arith.constant 1 : index
    %124 = memref.load %arg1[%c5_82, %c1_83] : memref<8x4xf32, #tpu.memory_space<smem>>
    %125 = vector.broadcast %124 : f32 to vector<18x18xf32>
    %126 = arith.mulf %3, %125 : vector<18x18xf32>
    %127 = arith.addf %123, %126 : vector<18x18xf32>
    %c5_84 = arith.constant 5 : index
    %c2_85 = arith.constant 2 : index
    %128 = memref.load %arg1[%c5_84, %c2_85] : memref<8x4xf32, #tpu.memory_space<smem>>
    %129 = vector.broadcast %128 : f32 to vector<18x18xf32>
    %130 = arith.mulf %5, %129 : vector<18x18xf32>
    %131 = arith.addf %127, %130 : vector<18x18xf32>
    %c5_86 = arith.constant 5 : index
    %c3_87 = arith.constant 3 : index
    %132 = memref.load %arg1[%c5_86, %c3_87] : memref<8x4xf32, #tpu.memory_space<smem>>
    %133 = vector.broadcast %132 : f32 to vector<18x18xf32>
    %134 = arith.addf %131, %133 : vector<18x18xf32>
    %cst_88 = arith.constant 0.000000e+00 : f32
    %cst_89 = arith.constant 6.000000e+00 : f32
    %135 = vector.broadcast %cst_88 : f32 to vector<18x18xf32>
    %136 = arith.maximumf %135, %134 : vector<18x18xf32>
    %137 = vector.broadcast %cst_89 : f32 to vector<18x18xf32>
    %138 = arith.minimumf %137, %136 : vector<18x18xf32>
    %cst_90 = arith.constant 0.166666672 : f32
    %139 = vector.broadcast %cst_90 : f32 to vector<18x18xf32>
    %140 = arith.mulf %138, %139 : vector<18x18xf32>
    %c0_91 = arith.constant 0 : index
    %c5_92 = arith.constant 5 : index
    %c0_93 = arith.constant 0 : index
    %c0_94 = arith.constant 0 : index
    %141 = vector.load %arg2[%c0_91, %c5_92, %c0_93, %c0_94] : memref<2x8x18x18xf32, #tpu.memory_space<vmem>>, vector<1x1x18x18xf32>
    %142 = vector.shape_cast %141 : vector<1x1x18x18xf32> to vector<18x18xf32>
    %143 = vector.shape_cast %140 : vector<18x18xf32> to vector<1x1x18x18xf32>
    tpu.vector_store %arg2[%c0_91, %c5_92, %c0_93, %c0_94], %143 {strides = array<i32>} : memref<2x8x18x18xf32, #tpu.memory_space<vmem>>, vector<1x1x18x18xf32>,
    %c6 = arith.constant 6 : index
    %c0_95 = arith.constant 0 : index
    %144 = memref.load %arg1[%c6, %c0_95] : memref<8x4xf32, #tpu.memory_space<smem>>
    %145 = vector.broadcast %144 : f32 to vector<18x18xf32>
    %146 = arith.mulf %1, %145 : vector<18x18xf32>
    %c6_96 = arith.constant 6 : index
    %c1_97 = arith.constant 1 : index
    %147 = memref.load %arg1[%c6_96, %c1_97] : memref<8x4xf32, #tpu.memory_space<smem>>
    %148 = vector.broadcast %147 : f32 to vector<18x18xf32>
    %149 = arith.mulf %3, %148 : vector<18x18xf32>
    %150 = arith.addf %146, %149 : vector<18x18xf32>
    %c6_98 = arith.constant 6 : index
    %c2_99 = arith.constant 2 : index
    %151 = memref.load %arg1[%c6_98, %c2_99] : memref<8x4xf32, #tpu.memory_space<smem>>
    %152 = vector.broadcast %151 : f32 to vector<18x18xf32>
    %153 = arith.mulf %5, %152 : vector<18x18xf32>
    %154 = arith.addf %150, %153 : vector<18x18xf32>
    %c6_100 = arith.constant 6 : index
    %c3_101 = arith.constant 3 : index
    %155 = memref.load %arg1[%c6_100, %c3_101] : memref<8x4xf32, #tpu.memory_space<smem>>
    %156 = vector.broadcast %155 : f32 to vector<18x18xf32>
    %157 = arith.addf %154, %156 : vector<18x18xf32>
    %cst_102 = arith.constant 0.000000e+00 : f32
    %cst_103 = arith.constant 6.000000e+00 : f32
    %158 = vector.broadcast %cst_102 : f32 to vector<18x18xf32>
    %159 = arith.maximumf %158, %157 : vector<18x18xf32>
    %160 = vector.broadcast %cst_103 : f32 to vector<18x18xf32>
    %161 = arith.minimumf %160, %159 : vector<18x18xf32>
    %cst_104 = arith.constant 0.166666672 : f32
    %162 = vector.broadcast %cst_104 : f32 to vector<18x18xf32>
    %163 = arith.mulf %161, %162 : vector<18x18xf32>
    %c0_105 = arith.constant 0 : index
    %c6_106 = arith.constant 6 : index
    %c0_107 = arith.constant 0 : index
    %c0_108 = arith.constant 0 : index
    %164 = vector.load %arg2[%c0_105, %c6_106, %c0_107, %c0_108] : memref<2x8x18x18xf32, #tpu.memory_space<vmem>>, vector<1x1x18x18xf32>
    %165 = vector.shape_cast %164 : vector<1x1x18x18xf32> to vector<18x18xf32>
    %166 = vector.shape_cast %163 : vector<18x18xf32> to vector<1x1x18x18xf32>
    tpu.vector_store %arg2[%c0_105, %c6_106, %c0_107, %c0_108], %166 {strides = array<i32>} : memref<2x8x18x18xf32, #tpu.memory_space<vmem>>, vector<1x1x18x18xf32>,
    %c7 = arith.constant 7 : index
    %c0_109 = arith.constant 0 : index
    %167 = memref.load %arg1[%c7, %c0_109] : memref<8x4xf32, #tpu.memory_space<smem>>
    %168 = vector.broadcast %167 : f32 to vector<18x18xf32>
    %169 = arith.mulf %1, %168 : vector<18x18xf32>
    %c7_110 = arith.constant 7 : index
    %c1_111 = arith.constant 1 : index
    %170 = memref.load %arg1[%c7_110, %c1_111] : memref<8x4xf32, #tpu.memory_space<smem>>
    %171 = vector.broadcast %170 : f32 to vector<18x18xf32>
    %172 = arith.mulf %3, %171 : vector<18x18xf32>
    %173 = arith.addf %169, %172 : vector<18x18xf32>
    %c7_112 = arith.constant 7 : index
    %c2_113 = arith.constant 2 : index
    %174 = memref.load %arg1[%c7_112, %c2_113] : memref<8x4xf32, #tpu.memory_space<smem>>
    %175 = vector.broadcast %174 : f32 to vector<18x18xf32>
    %176 = arith.mulf %5, %175 : vector<18x18xf32>
    %177 = arith.addf %173, %176 : vector<18x18xf32>
    %c7_114 = arith.constant 7 : index
    %c3_115 = arith.constant 3 : index
    %178 = memref.load %arg1[%c7_114, %c3_115] : memref<8x4xf32, #tpu.memory_space<smem>>
    %179 = vector.broadcast %178 : f32 to vector<18x18xf32>
    %180 = arith.addf %177, %179 : vector<18x18xf32>
    %cst_116 = arith.constant 0.000000e+00 : f32
    %cst_117 = arith.constant 6.000000e+00 : f32
    %181 = vector.broadcast %cst_116 : f32 to vector<18x18xf32>
    %182 = arith.maximumf %181, %180 : vector<18x18xf32>
    %183 = vector.broadcast %cst_117 : f32 to vector<18x18xf32>
    %184 = arith.minimumf %183, %182 : vector<18x18xf32>
    %cst_118 = arith.constant 0.166666672 : f32
    %185 = vector.broadcast %cst_118 : f32 to vector<18x18xf32>
    %186 = arith.mulf %184, %185 : vector<18x18xf32>
    %c0_119 = arith.constant 0 : index
    %c7_120 = arith.constant 7 : index
    %c0_121 = arith.constant 0 : index
    %c0_122 = arith.constant 0 : index
    %187 = vector.load %arg2[%c0_119, %c7_120, %c0_121, %c0_122] : memref<2x8x18x18xf32, #tpu.memory_space<vmem>>, vector<1x1x18x18xf32>
    %188 = vector.shape_cast %187 : vector<1x1x18x18xf32> to vector<18x18xf32>
    %189 = vector.shape_cast %186 : vector<18x18xf32> to vector<1x1x18x18xf32>
    tpu.vector_store %arg2[%c0_119, %c7_120, %c0_121, %c0_122], %189 {strides = array<i32>} : memref<2x8x18x18xf32, #tpu.memory_space<vmem>>, vector<1x1x18x18xf32>,
    %c1_123 = arith.constant 1 : index
    %c0_124 = arith.constant 0 : index
    %c0_125 = arith.constant 0 : index
    %c0_126 = arith.constant 0 : index
    %190 = vector.load %arg0[%c1_123, %c0_124, %c0_125, %c0_126] : memref<2x3x18x18xf32, #tpu.memory_space<vmem>>, vector<1x1x18x18xf32>
    %191 = vector.shape_cast %190 : vector<1x1x18x18xf32> to vector<18x18xf32>
    %c1_127 = arith.constant 1 : index
    %c1_128 = arith.constant 1 : index
    %c0_129 = arith.constant 0 : index
    %c0_130 = arith.constant 0 : index
    %192 = vector.load %arg0[%c1_127, %c1_128, %c0_129, %c0_130] : memref<2x3x18x18xf32, #tpu.memory_space<vmem>>, vector<1x1x18x18xf32>
    %193 = vector.shape_cast %192 : vector<1x1x18x18xf32> to vector<18x18xf32>
    %c1_131 = arith.constant 1 : index
    %c2_132 = arith.constant 2 : index
    %c0_133 = arith.constant 0 : index
    %c0_134 = arith.constant 0 : index
    %194 = vector.load %arg0[%c1_131, %c2_132, %c0_133, %c0_134] : memref<2x3x18x18xf32, #tpu.memory_space<vmem>>, vector<1x1x18x18xf32>
    %195 = vector.shape_cast %194 : vector<1x1x18x18xf32> to vector<18x18xf32>
    %c0_135 = arith.constant 0 : index
    %c0_136 = arith.constant 0 : index
    %196 = memref.load %arg1[%c0_135, %c0_136] : memref<8x4xf32, #tpu.memory_space<smem>>
    %197 = vector.broadcast %196 : f32 to vector<18x18xf32>
    %198 = arith.mulf %191, %197 : vector<18x18xf32>
    %c0_137 = arith.constant 0 : index
    %c1_138 = arith.constant 1 : index
    %199 = memref.load %arg1[%c0_137, %c1_138] : memref<8x4xf32, #tpu.memory_space<smem>>
    %200 = vector.broadcast %199 : f32 to vector<18x18xf32>
    %201 = arith.mulf %193, %200 : vector<18x18xf32>
    %202 = arith.addf %198, %201 : vector<18x18xf32>
    %c0_139 = arith.constant 0 : index
    %c2_140 = arith.constant 2 : index
    %203 = memref.load %arg1[%c0_139, %c2_140] : memref<8x4xf32, #tpu.memory_space<smem>>
    %204 = vector.broadcast %203 : f32 to vector<18x18xf32>
    %205 = arith.mulf %195, %204 : vector<18x18xf32>
    %206 = arith.addf %202, %205 : vector<18x18xf32>
    %c0_141 = arith.constant 0 : index
    %c3_142 = arith.constant 3 : index
    %207 = memref.load %arg1[%c0_141, %c3_142] : memref<8x4xf32, #tpu.memory_space<smem>>
    %208 = vector.broadcast %207 : f32 to vector<18x18xf32>
    %209 = arith.addf %206, %208 : vector<18x18xf32>
    %cst_143 = arith.constant 0.000000e+00 : f32
    %cst_144 = arith.constant 6.000000e+00 : f32
    %210 = vector.broadcast %cst_143 : f32 to vector<18x18xf32>
    %211 = arith.maximumf %210, %209 : vector<18x18xf32>
    %212 = vector.broadcast %cst_144 : f32 to vector<18x18xf32>
    %213 = arith.minimumf %212, %211 : vector<18x18xf32>
    %cst_145 = arith.constant 0.166666672 : f32
    %214 = vector.broadcast %cst_145 : f32 to vector<18x18xf32>
    %215 = arith.mulf %213, %214 : vector<18x18xf32>
    %c1_146 = arith.constant 1 : index
    %c0_147 = arith.constant 0 : index
    %c0_148 = arith.constant 0 : index
    %c0_149 = arith.constant 0 : index
    %216 = vector.load %arg2[%c1_146, %c0_147, %c0_148, %c0_149] : memref<2x8x18x18xf32, #tpu.memory_space<vmem>>, vector<1x1x18x18xf32>
    %217 = vector.shape_cast %216 : vector<1x1x18x18xf32> to vector<18x18xf32>
    %218 = vector.shape_cast %215 : vector<18x18xf32> to vector<1x1x18x18xf32>
    tpu.vector_store %arg2[%c1_146, %c0_147, %c0_148, %c0_149], %218 {strides = array<i32>} : memref<2x8x18x18xf32, #tpu.memory_space<vmem>>, vector<1x1x18x18xf32>,
    %c1_150 = arith.constant 1 : index
    %c0_151 = arith.constant 0 : index
    %219 = memref.load %arg1[%c1_150, %c0_151] : memref<8x4xf32, #tpu.memory_space<smem>>
    %220 = vector.broadcast %219 : f32 to vector<18x18xf32>
    %221 = arith.mulf %191, %220 : vector<18x18xf32>
    %c1_152 = arith.constant 1 : index
    %c1_153 = arith.constant 1 : index
    %222 = memref.load %arg1[%c1_152, %c1_153] : memref<8x4xf32, #tpu.memory_space<smem>>
    %223 = vector.broadcast %222 : f32 to vector<18x18xf32>
    %224 = arith.mulf %193, %223 : vector<18x18xf32>
    %225 = arith.addf %221, %224 : vector<18x18xf32>
    %c1_154 = arith.constant 1 : index
    %c2_155 = arith.constant 2 : index
    %226 = memref.load %arg1[%c1_154, %c2_155] : memref<8x4xf32, #tpu.memory_space<smem>>
    %227 = vector.broadcast %226 : f32 to vector<18x18xf32>
    %228 = arith.mulf %195, %227 : vector<18x18xf32>
    %229 = arith.addf %225, %228 : vector<18x18xf32>
    %c1_156 = arith.constant 1 : index
    %c3_157 = arith.constant 3 : index
    %230 = memref.load %arg1[%c1_156, %c3_157] : memref<8x4xf32, #tpu.memory_space<smem>>
    %231 = vector.broadcast %230 : f32 to vector<18x18xf32>
    %232 = arith.addf %229, %231 : vector<18x18xf32>
    %cst_158 = arith.constant 0.000000e+00 : f32
    %cst_159 = arith.constant 6.000000e+00 : f32
    %233 = vector.broadcast %cst_158 : f32 to vector<18x18xf32>
    %234 = arith.maximumf %233, %232 : vector<18x18xf32>
    %235 = vector.broadcast %cst_159 : f32 to vector<18x18xf32>
    %236 = arith.minimumf %235, %234 : vector<18x18xf32>
    %cst_160 = arith.constant 0.166666672 : f32
    %237 = vector.broadcast %cst_160 : f32 to vector<18x18xf32>
    %238 = arith.mulf %236, %237 : vector<18x18xf32>
    %c1_161 = arith.constant 1 : index
    %c1_162 = arith.constant 1 : index
    %c0_163 = arith.constant 0 : index
    %c0_164 = arith.constant 0 : index
    %239 = vector.load %arg2[%c1_161, %c1_162, %c0_163, %c0_164] : memref<2x8x18x18xf32, #tpu.memory_space<vmem>>, vector<1x1x18x18xf32>
    %240 = vector.shape_cast %239 : vector<1x1x18x18xf32> to vector<18x18xf32>
    %241 = vector.shape_cast %238 : vector<18x18xf32> to vector<1x1x18x18xf32>
    tpu.vector_store %arg2[%c1_161, %c1_162, %c0_163, %c0_164], %241 {strides = array<i32>} : memref<2x8x18x18xf32, #tpu.memory_space<vmem>>, vector<1x1x18x18xf32>,
    %c2_165 = arith.constant 2 : index
    %c0_166 = arith.constant 0 : index
    %242 = memref.load %arg1[%c2_165, %c0_166] : memref<8x4xf32, #tpu.memory_space<smem>>
    %243 = vector.broadcast %242 : f32 to vector<18x18xf32>
    %244 = arith.mulf %191, %243 : vector<18x18xf32>
    %c2_167 = arith.constant 2 : index
    %c1_168 = arith.constant 1 : index
    %245 = memref.load %arg1[%c2_167, %c1_168] : memref<8x4xf32, #tpu.memory_space<smem>>
    %246 = vector.broadcast %245 : f32 to vector<18x18xf32>
    %247 = arith.mulf %193, %246 : vector<18x18xf32>
    %248 = arith.addf %244, %247 : vector<18x18xf32>
    %c2_169 = arith.constant 2 : index
    %c2_170 = arith.constant 2 : index
    %249 = memref.load %arg1[%c2_169, %c2_170] : memref<8x4xf32, #tpu.memory_space<smem>>
    %250 = vector.broadcast %249 : f32 to vector<18x18xf32>
    %251 = arith.mulf %195, %250 : vector<18x18xf32>
    %252 = arith.addf %248, %251 : vector<18x18xf32>
    %c2_171 = arith.constant 2 : index
    %c3_172 = arith.constant 3 : index
    %253 = memref.load %arg1[%c2_171, %c3_172] : memref<8x4xf32, #tpu.memory_space<smem>>
    %254 = vector.broadcast %253 : f32 to vector<18x18xf32>
    %255 = arith.addf %252, %254 : vector<18x18xf32>
    %cst_173 = arith.constant 0.000000e+00 : f32
    %cst_174 = arith.constant 6.000000e+00 : f32
    %256 = vector.broadcast %cst_173 : f32 to vector<18x18xf32>
    %257 = arith.maximumf %256, %255 : vector<18x18xf32>
    %258 = vector.broadcast %cst_174 : f32 to vector<18x18xf32>
    %259 = arith.minimumf %258, %257 : vector<18x18xf32>
    %cst_175 = arith.constant 0.166666672 : f32
    %260 = vector.broadcast %cst_175 : f32 to vector<18x18xf32>
    %261 = arith.mulf %259, %260 : vector<18x18xf32>
    %c1_176 = arith.constant 1 : index
    %c2_177 = arith.constant 2 : index
    %c0_178 = arith.constant 0 : index
    %c0_179 = arith.constant 0 : index
    %262 = vector.load %arg2[%c1_176, %c2_177, %c0_178, %c0_179] : memref<2x8x18x18xf32, #tpu.memory_space<vmem>>, vector<1x1x18x18xf32>
    %263 = vector.shape_cast %262 : vector<1x1x18x18xf32> to vector<18x18xf32>
    %264 = vector.shape_cast %261 : vector<18x18xf32> to vector<1x1x18x18xf32>
    tpu.vector_store %arg2[%c1_176, %c2_177, %c0_178, %c0_179], %264 {strides = array<i32>} : memref<2x8x18x18xf32, #tpu.memory_space<vmem>>, vector<1x1x18x18xf32>,
    %c3_180 = arith.constant 3 : index
    %c0_181 = arith.constant 0 : index
    %265 = memref.load %arg1[%c3_180, %c0_181] : memref<8x4xf32, #tpu.memory_space<smem>>
    %266 = vector.broadcast %265 : f32 to vector<18x18xf32>
    %267 = arith.mulf %191, %266 : vector<18x18xf32>
    %c3_182 = arith.constant 3 : index
    %c1_183 = arith.constant 1 : index
    %268 = memref.load %arg1[%c3_182, %c1_183] : memref<8x4xf32, #tpu.memory_space<smem>>
    %269 = vector.broadcast %268 : f32 to vector<18x18xf32>
    %270 = arith.mulf %193, %269 : vector<18x18xf32>
    %271 = arith.addf %267, %270 : vector<18x18xf32>
    %c3_184 = arith.constant 3 : index
    %c2_185 = arith.constant 2 : index
    %272 = memref.load %arg1[%c3_184, %c2_185] : memref<8x4xf32, #tpu.memory_space<smem>>
    %273 = vector.broadcast %272 : f32 to vector<18x18xf32>
    %274 = arith.mulf %195, %273 : vector<18x18xf32>
    %275 = arith.addf %271, %274 : vector<18x18xf32>
    %c3_186 = arith.constant 3 : index
    %c3_187 = arith.constant 3 : index
    %276 = memref.load %arg1[%c3_186, %c3_187] : memref<8x4xf32, #tpu.memory_space<smem>>
    %277 = vector.broadcast %276 : f32 to vector<18x18xf32>
    %278 = arith.addf %275, %277 : vector<18x18xf32>
    %cst_188 = arith.constant 0.000000e+00 : f32
    %cst_189 = arith.constant 6.000000e+00 : f32
    %279 = vector.broadcast %cst_188 : f32 to vector<18x18xf32>
    %280 = arith.maximumf %279, %278 : vector<18x18xf32>
    %281 = vector.broadcast %cst_189 : f32 to vector<18x18xf32>
    %282 = arith.minimumf %281, %280 : vector<18x18xf32>
    %cst_190 = arith.constant 0.166666672 : f32
    %283 = vector.broadcast %cst_190 : f32 to vector<18x18xf32>
    %284 = arith.mulf %282, %283 : vector<18x18xf32>
    %c1_191 = arith.constant 1 : index
    %c3_192 = arith.constant 3 : index
    %c0_193 = arith.constant 0 : index
    %c0_194 = arith.constant 0 : index
    %285 = vector.load %arg2[%c1_191, %c3_192, %c0_193, %c0_194] : memref<2x8x18x18xf32, #tpu.memory_space<vmem>>, vector<1x1x18x18xf32>
    %286 = vector.shape_cast %285 : vector<1x1x18x18xf32> to vector<18x18xf32>
    %287 = vector.shape_cast %284 : vector<18x18xf32> to vector<1x1x18x18xf32>
    tpu.vector_store %arg2[%c1_191, %c3_192, %c0_193, %c0_194], %287 {strides = array<i32>} : memref<2x8x18x18xf32, #tpu.memory_space<vmem>>, vector<1x1x18x18xf32>,
    %c4_195 = arith.constant 4 : index
    %c0_196 = arith.constant 0 : index
    %288 = memref.load %arg1[%c4_195, %c0_196] : memref<8x4xf32, #tpu.memory_space<smem>>
    %289 = vector.broadcast %288 : f32 to vector<18x18xf32>
    %290 = arith.mulf %191, %289 : vector<18x18xf32>
    %c4_197 = arith.constant 4 : index
    %c1_198 = arith.constant 1 : index
    %291 = memref.load %arg1[%c4_197, %c1_198] : memref<8x4xf32, #tpu.memory_space<smem>>
    %292 = vector.broadcast %291 : f32 to vector<18x18xf32>
    %293 = arith.mulf %193, %292 : vector<18x18xf32>
    %294 = arith.addf %290, %293 : vector<18x18xf32>
    %c4_199 = arith.constant 4 : index
    %c2_200 = arith.constant 2 : index
    %295 = memref.load %arg1[%c4_199, %c2_200] : memref<8x4xf32, #tpu.memory_space<smem>>
    %296 = vector.broadcast %295 : f32 to vector<18x18xf32>
    %297 = arith.mulf %195, %296 : vector<18x18xf32>
    %298 = arith.addf %294, %297 : vector<18x18xf32>
    %c4_201 = arith.constant 4 : index
    %c3_202 = arith.constant 3 : index
    %299 = memref.load %arg1[%c4_201, %c3_202] : memref<8x4xf32, #tpu.memory_space<smem>>
    %300 = vector.broadcast %299 : f32 to vector<18x18xf32>
    %301 = arith.addf %298, %300 : vector<18x18xf32>
    %cst_203 = arith.constant 0.000000e+00 : f32
    %cst_204 = arith.constant 6.000000e+00 : f32
    %302 = vector.broadcast %cst_203 : f32 to vector<18x18xf32>
    %303 = arith.maximumf %302, %301 : vector<18x18xf32>
    %304 = vector.broadcast %cst_204 : f32 to vector<18x18xf32>
    %305 = arith.minimumf %304, %303 : vector<18x18xf32>
    %cst_205 = arith.constant 0.166666672 : f32
    %306 = vector.broadcast %cst_205 : f32 to vector<18x18xf32>
    %307 = arith.mulf %305, %306 : vector<18x18xf32>
    %c1_206 = arith.constant 1 : index
    %c4_207 = arith.constant 4 : index
    %c0_208 = arith.constant 0 : index
    %c0_209 = arith.constant 0 : index
    %308 = vector.load %arg2[%c1_206, %c4_207, %c0_208, %c0_209] : memref<2x8x18x18xf32, #tpu.memory_space<vmem>>, vector<1x1x18x18xf32>
    %309 = vector.shape_cast %308 : vector<1x1x18x18xf32> to vector<18x18xf32>
    %310 = vector.shape_cast %307 : vector<18x18xf32> to vector<1x1x18x18xf32>
    tpu.vector_store %arg2[%c1_206, %c4_207, %c0_208, %c0_209], %310 {strides = array<i32>} : memref<2x8x18x18xf32, #tpu.memory_space<vmem>>, vector<1x1x18x18xf32>,
    %c5_210 = arith.constant 5 : index
    %c0_211 = arith.constant 0 : index
    %311 = memref.load %arg1[%c5_210, %c0_211] : memref<8x4xf32, #tpu.memory_space<smem>>
    %312 = vector.broadcast %311 : f32 to vector<18x18xf32>
    %313 = arith.mulf %191, %312 : vector<18x18xf32>
    %c5_212 = arith.constant 5 : index
    %c1_213 = arith.constant 1 : index
    %314 = memref.load %arg1[%c5_212, %c1_213] : memref<8x4xf32, #tpu.memory_space<smem>>
    %315 = vector.broadcast %314 : f32 to vector<18x18xf32>
    %316 = arith.mulf %193, %315 : vector<18x18xf32>
    %317 = arith.addf %313, %316 : vector<18x18xf32>
    %c5_214 = arith.constant 5 : index
    %c2_215 = arith.constant 2 : index
    %318 = memref.load %arg1[%c5_214, %c2_215] : memref<8x4xf32, #tpu.memory_space<smem>>
    %319 = vector.broadcast %318 : f32 to vector<18x18xf32>
    %320 = arith.mulf %195, %319 : vector<18x18xf32>
    %321 = arith.addf %317, %320 : vector<18x18xf32>
    %c5_216 = arith.constant 5 : index
    %c3_217 = arith.constant 3 : index
    %322 = memref.load %arg1[%c5_216, %c3_217] : memref<8x4xf32, #tpu.memory_space<smem>>
    %323 = vector.broadcast %322 : f32 to vector<18x18xf32>
    %324 = arith.addf %321, %323 : vector<18x18xf32>
    %cst_218 = arith.constant 0.000000e+00 : f32
    %cst_219 = arith.constant 6.000000e+00 : f32
    %325 = vector.broadcast %cst_218 : f32 to vector<18x18xf32>
    %326 = arith.maximumf %325, %324 : vector<18x18xf32>
    %327 = vector.broadcast %cst_219 : f32 to vector<18x18xf32>
    %328 = arith.minimumf %327, %326 : vector<18x18xf32>
    %cst_220 = arith.constant 0.166666672 : f32
    %329 = vector.broadcast %cst_220 : f32 to vector<18x18xf32>
    %330 = arith.mulf %328, %329 : vector<18x18xf32>
    %c1_221 = arith.constant 1 : index
    %c5_222 = arith.constant 5 : index
    %c0_223 = arith.constant 0 : index
    %c0_224 = arith.constant 0 : index
    %331 = vector.load %arg2[%c1_221, %c5_222, %c0_223, %c0_224] : memref<2x8x18x18xf32, #tpu.memory_space<vmem>>, vector<1x1x18x18xf32>
    %332 = vector.shape_cast %331 : vector<1x1x18x18xf32> to vector<18x18xf32>
    %333 = vector.shape_cast %330 : vector<18x18xf32> to vector<1x1x18x18xf32>
    tpu.vector_store %arg2[%c1_221, %c5_222, %c0_223, %c0_224], %333 {strides = array<i32>} : memref<2x8x18x18xf32, #tpu.memory_space<vmem>>, vector<1x1x18x18xf32>,
    %c6_225 = arith.constant 6 : index
    %c0_226 = arith.constant 0 : index
    %334 = memref.load %arg1[%c6_225, %c0_226] : memref<8x4xf32, #tpu.memory_space<smem>>
    %335 = vector.broadcast %334 : f32 to vector<18x18xf32>
    %336 = arith.mulf %191, %335 : vector<18x18xf32>
    %c6_227 = arith.constant 6 : index
    %c1_228 = arith.constant 1 : index
    %337 = memref.load %arg1[%c6_227, %c1_228] : memref<8x4xf32, #tpu.memory_space<smem>>
    %338 = vector.broadcast %337 : f32 to vector<18x18xf32>
    %339 = arith.mulf %193, %338 : vector<18x18xf32>
    %340 = arith.addf %336, %339 : vector<18x18xf32>
    %c6_229 = arith.constant 6 : index
    %c2_230 = arith.constant 2 : index
    %341 = memref.load %arg1[%c6_229, %c2_230] : memref<8x4xf32, #tpu.memory_space<smem>>
    %342 = vector.broadcast %341 : f32 to vector<18x18xf32>
    %343 = arith.mulf %195, %342 : vector<18x18xf32>
    %344 = arith.addf %340, %343 : vector<18x18xf32>
    %c6_231 = arith.constant 6 : index
    %c3_232 = arith.constant 3 : index
    %345 = memref.load %arg1[%c6_231, %c3_232] : memref<8x4xf32, #tpu.memory_space<smem>>
    %346 = vector.broadcast %345 : f32 to vector<18x18xf32>
    %347 = arith.addf %344, %346 : vector<18x18xf32>
    %cst_233 = arith.constant 0.000000e+00 : f32
    %cst_234 = arith.constant 6.000000e+00 : f32
    %348 = vector.broadcast %cst_233 : f32 to vector<18x18xf32>
    %349 = arith.maximumf %348, %347 : vector<18x18xf32>
    %350 = vector.broadcast %cst_234 : f32 to vector<18x18xf32>
    %351 = arith.minimumf %350, %349 : vector<18x18xf32>
    %cst_235 = arith.constant 0.166666672 : f32
    %352 = vector.broadcast %cst_235 : f32 to vector<18x18xf32>
    %353 = arith.mulf %351, %352 : vector<18x18xf32>
    %c1_236 = arith.constant 1 : index
    %c6_237 = arith.constant 6 : index
    %c0_238 = arith.constant 0 : index
    %c0_239 = arith.constant 0 : index
    %354 = vector.load %arg2[%c1_236, %c6_237, %c0_238, %c0_239] : memref<2x8x18x18xf32, #tpu.memory_space<vmem>>, vector<1x1x18x18xf32>
    %355 = vector.shape_cast %354 : vector<1x1x18x18xf32> to vector<18x18xf32>
    %356 = vector.shape_cast %353 : vector<18x18xf32> to vector<1x1x18x18xf32>
    tpu.vector_store %arg2[%c1_236, %c6_237, %c0_238, %c0_239], %356 {strides = array<i32>} : memref<2x8x18x18xf32, #tpu.memory_space<vmem>>, vector<1x1x18x18xf32>,
    %c7_240 = arith.constant 7 : index
    %c0_241 = arith.constant 0 : index
    %357 = memref.load %arg1[%c7_240, %c0_241] : memref<8x4xf32, #tpu.memory_space<smem>>
    %358 = vector.broadcast %357 : f32 to vector<18x18xf32>
    %359 = arith.mulf %191, %358 : vector<18x18xf32>
    %c7_242 = arith.constant 7 : index
    %c1_243 = arith.constant 1 : index
    %360 = memref.load %arg1[%c7_242, %c1_243] : memref<8x4xf32, #tpu.memory_space<smem>>
    %361 = vector.broadcast %360 : f32 to vector<18x18xf32>
    %362 = arith.mulf %193, %361 : vector<18x18xf32>
    %363 = arith.addf %359, %362 : vector<18x18xf32>
    %c7_244 = arith.constant 7 : index
    %c2_245 = arith.constant 2 : index
    %364 = memref.load %arg1[%c7_244, %c2_245] : memref<8x4xf32, #tpu.memory_space<smem>>
    %365 = vector.broadcast %364 : f32 to vector<18x18xf32>
    %366 = arith.mulf %195, %365 : vector<18x18xf32>
    %367 = arith.addf %363, %366 : vector<18x18xf32>
    %c7_246 = arith.constant 7 : index
    %c3_247 = arith.constant 3 : index
    %368 = memref.load %arg1[%c7_246, %c3_247] : memref<8x4xf32, #tpu.memory_space<smem>>
    %369 = vector.broadcast %368 : f32 to vector<18x18xf32>
    %370 = arith.addf %367, %369 : vector<18x18xf32>
    %cst_248 = arith.constant 0.000000e+00 : f32
    %cst_249 = arith.constant 6.000000e+00 : f32
    %371 = vector.broadcast %cst_248 : f32 to vector<18x18xf32>
    %372 = arith.maximumf %371, %370 : vector<18x18xf32>
    %373 = vector.broadcast %cst_249 : f32 to vector<18x18xf32>
    %374 = arith.minimumf %373, %372 : vector<18x18xf32>
    %cst_250 = arith.constant 0.166666672 : f32
    %375 = vector.broadcast %cst_250 : f32 to vector<18x18xf32>
    %376 = arith.mulf %374, %375 : vector<18x18xf32>
    %c1_251 = arith.constant 1 : index
    %c7_252 = arith.constant 7 : index
    %c0_253 = arith.constant 0 : index
    %c0_254 = arith.constant 0 : index
    %377 = vector.load %arg2[%c1_251, %c7_252, %c0_253, %c0_254] : memref<2x8x18x18xf32, #tpu.memory_space<vmem>>, vector<1x1x18x18xf32>
    %378 = vector.shape_cast %377 : vector<1x1x18x18xf32> to vector<18x18xf32>
    %379 = vector.shape_cast %376 : vector<18x18xf32> to vector<1x1x18x18xf32>
    tpu.vector_store %arg2[%c1_251, %c7_252, %c0_253, %c0_254], %379 {strides = array<i32>} : memref<2x8x18x18xf32, #tpu.memory_space<vmem>>, vector<1x1x18x18xf32>,
    return
  }
}

</mosaic_0001>

<bundles_post_ra>
// kernel: tpu_custom_call.1
= control target key start
LH: loop header
LB: loop body
LE: loop exit
PB: predicated region body
PF: predicated region fallthrough
CT: control target
= control target key end

     0   :  { %7 = vsyncpa [#allocation3], 0  ;;  %s1593_s0 = inlined_call_operand.vmem [shape: f32[2,3,18,18], index: 0, kind: input, shape index: {}]   ;;  %s1594_s1 = inlined_call_operand.vmem [shape: f32[8,4], index: 1, kind: input, shape index: {}]   ;;  %s1595_s2 = inlined_call_operand.vmem [shape: f32[2,8,18,18], index: 2, kind: output, shape index: {}]  }
   0x1   :  { %s16_s11 = sshll.u32 %s1594_s1, 4  ;;  %s17_s11 = int_to_ptr.vmem [resolvable:$true] %s16_s11 }
   0x2   :  { %s800_s12 = scalar_lea.vmem %s17_s11, 128  ;;  %p805_p1 = scmp.lt.s32.totalorder %s17_s11, %s17_s11 }
   0x3   :  { %p801_p0 = scmp.ne.s32.totalorder %s17_s11, %s800_s12  ;;  %p806_p2 = scmp.lt.s32.totalorder %s800_s12, %s800_s12 }
   0x5   :  { %p807_p3 = por %p806_p2, %p805_p1 }
   0x7   :  { %p808_p4 = pnand %p807_p3, %p801_p0 }
   0x9   :  { %811 = shalt.err (!%p808_p4)
}
   0xa   :  { %s814_s13 = smov [#allocation2]  }
   0xb   :  { %19 = dma.vmem_to_smem %s17_s11, 128, %s814_s13, [#allocation3]  }
   0xc   :  { %812 = dma.done.wait [#allocation3], 128  }
   0xd   :  { %813 = vsyncadd [#allocation3], 4294967168 }
   0xe   :  { %23 = sfence }
   0xf   :  { %s35_s14 = sld [smem:[#allocation2]]  ;;  %s683_s15 = sld [smem:[#allocation2 + $0x1]]  ;;  %v836_v0 = vld [vmem:[%s1593_s0] sm:$0xff]  ;;  %v841_v1 = vld [vmem:[%s1593_s0 + $0x18] sm:$0xff]  ;;  %v846_v2 = vld [vmem:[%s1593_s0 + $0x8] sm:$0xff]  ;;  %vm70_vm0 = vcmask 146432  }
  0x10   :  { %s684_s16 = sld [smem:[#allocation2 + $0x2]]  ;;  %s685_s17 = sld [smem:[#allocation2 + $0x3]]  ;;  %v853_v3 = vld [vmem:[%s1593_s0 + $0x30] sm:$0xff]  ;;  %v858_v4 = vld [vmem:[%s1593_s0 + $0x20] sm:$0xff]  ;;  %v863_v5 = vld [vmem:[%s1593_s0 + $0x38] sm:$0xff]  ;;  %vm73_vm1 = vcmask 140288  }
  0x11   :  { %s686_s1 = sld [smem:[#allocation2 + $0x80]]  ;;  %s687_s24 = sld [smem:[#allocation2 + $0x81]]  ;;  %v872_v7 = vld [vmem:[%s1593_s0 + $0x10] sm:$0x3]  ;;  %v877_v8 = vld [vmem:[%s1593_s0 + $0x28] sm:$0x3] }
  0x12   :  { %s848_s25 = sld [smem:[#allocation2 + $0x82]]  ;;  %s865_s4 = sld [smem:[#allocation2 + $0x83]]  ;;  %v882_v9 = vld [vmem:[%s1593_s0 + $0x40] sm:$0x3] }
  0x13   :  { %s900_s11 = sld [smem:[#allocation2 + $0x100]]  ;;  %s914_s12 = sld [smem:[#allocation2 + $0x101]] }
  0x14   :  { %s928_s13 = sld [smem:[#allocation2 + $0x102]]  ;;  %s968_s18 = sld [smem:[#allocation2 + $0x183]] }
  0x15   :  { %v867_v6 = vstv %s35_s14  ;;  %v886_v11 = vstv %s683_s15  ;;  %s940_s14 = sld [smem:[#allocation2 + $0x103]]  ;;  %s956_s15 = sld [smem:[#allocation2 + $0x180]] }
  0x16   :  { %v37_v10 = vmul.f32 %v867_v6, %v836_v0  ;;  %v888_v12 = vstv %s684_s16  ;;  %v38_v13 = vmul.f32 %v867_v6, %v846_v2  ;;  %v42_v14 = vmul.f32 %v841_v1, %v886_v11  ;;  %s958_s16 = sld [smem:[#allocation2 + $0x181]]  ;;  %s1004_s26 = sld [smem:[#allocation2 + $0x200]] }
  0x17   :  { %v50_v15 = vmul.f32 %v853_v3, %v888_v12  ;;  %v896_v16 = vstv %s685_s17  ;;  %v43_v17 = vmul.f32 %v858_v4, %v886_v11  ;;  %v51_v18 = vmul.f32 %v863_v5, %v888_v12  ;;  %s961_s17 = sld [smem:[#allocation2 + $0x182]]  ;;  %s1013_s27 = sld [smem:[#allocation2 + $0x201]] }
  0x18   :  { %v39_v19 = vmul.f32 %v867_v6, %v872_v7  ;;  %v44_v20 = vmul.f32 %v877_v8, %v886_v11  ;;  %v52_v21 = vmul.f32 %v882_v9, %v888_v12  ;;  %v45_v22 = vadd.f32 %v42_v14, %v37_v10  ;;  %s1029_s30 = sld [smem:[#allocation2 + $0x202]]  ;;  %s1031_s3 = sld [smem:[#allocation2 + $0x203]] }
  0x19   :  { %v46_v23 = vadd.f32 %v43_v17, %v38_v13  ;;  %v910_v24 = vstv %s686_s1  ;;  %v912_v25 = vstv %s687_s24  ;;  %v921_v29 = vstv %s848_s25  ;;  %s1057_s6 = sld [smem:[#allocation2 + $0x280]]  ;;  %s1059_s7 = sld [smem:[#allocation2 + $0x281]] }
  0x1a   :  { %v47_v26 = vadd.f32 %v44_v20, %v39_v19  ;;  %v77_v27 = vmul.f32 %v910_v24, %v836_v0  ;;  %v82_v28 = vmul.f32 %v841_v1, %v912_v25  ;;  %v53_v30 = vadd.f32 %v50_v15, %v45_v22  ;;  %s1072_s10 = sld [smem:[#allocation2 + $0x282]]  ;;  %s1121_s19 = sld [smem:[#allocation2 + $0x301]] }
  0x1b   :  { %v54_v31 = vadd.f32 %v51_v18, %v46_v23  ;;  %v90_v32 = vmul.f32 %v853_v3, %v921_v29  ;;  %v926_v33 = vstv %s865_s4  ;;  %v78_v36 = vmul.f32 %v910_v24, %v846_v2  ;;  %s1123_s1 = sld [smem:[#allocation2 + $0x302]]  ;;  %s1140_s22 = sld [smem:[#allocation2 + $0x303]] }
  0x1c   :  { %v55_v34 = vadd.f32 %v52_v21, %v47_v26  ;;  %v85_v35 = vadd.f32 %v82_v28, %v77_v27  ;;  %v83_v37 = vmul.f32 %v858_v4, %v912_v25  ;;  %v58_v38 = vadd.f32 %v896_v16, %v53_v30  ;;  %s1162_s25 = sld [smem:[#allocation2 + $0x380]]  ;;  %s1171_s28 = sld [smem:[#allocation2 + $0x381]] }
  0x1d   :  { %v59_v39 = vadd.f32 %v896_v16, %v54_v31  ;;  %v91_v40 = vmul.f32 %v863_v5, %v921_v29  ;;  %v79_v41 = vmul.f32 %v910_v24, %v872_v7  ;;  %v84_v45 = vmul.f32 %v877_v8, %v912_v25  ;;  %s1179_s29 = sld [smem:[#allocation2 + $0x382]]  ;;  %s1195_s4 = sld [smem:[#allocation2 + $0x383]] }
  0x1e   :  { %v60_v42 = vadd.f32 %v896_v16, %v55_v34  ;;  %v93_v43 = vadd.f32 %v90_v32, %v85_v35  ;;  %v86_v44 = vadd.f32 %v83_v37, %v78_v36  ;;  %v61_v46 = vmax.f32 %v58_v38, 0.0 }
  0x1f   :  { %v62_v47 = vmax.f32 %v59_v39, 0.0  ;;  %v92_v48 = vmul.f32 %v882_v9, %v921_v29  ;;  %v948_v49 = vstv %s900_s11  ;;  %v87_v53 = vadd.f32 %v84_v45, %v79_v41  ;;  %s1081_s11 = sld [smem:[#allocation2 + $0x283]] }
  0x20   :  { %v63_v50 = vmax.f32 %v60_v42, 0.0  ;;  %v98_v51 = vadd.f32 %v926_v33, %v93_v43  ;;  %v94_v52 = vadd.f32 %v91_v40, %v86_v44  ;;  %v64_v54 = vmin.f32 %v61_v46, 6.0 }
  0x21   :  { %v65_v55 = vmin.f32 %v62_v47, 6.0  ;;  %v116_v56 = vmul.f32 %v948_v49, %v836_v0  ;;  %v954_v57 = vstv %s914_s12  ;;  %v95_v61 = vadd.f32 %v92_v48, %v87_v53 }
  0x22   :  { %v66_v58 = vmin.f32 %v63_v50, 6.0  ;;  %v101_v59 = vmax.f32 %v98_v51, 0.0  ;;  %v99_v60 = vadd.f32 %v926_v33, %v94_v52  ;;  %v67_v62 = vmul.f32 0.16666667, %v64_v54 }
  0x23   :  { %v68_v63 = vmul.f32 0.16666667, %v65_v55  ;;  %v121_v10 = vmul.f32 %v841_v1, %v954_v57  ;;  %v966_v13 = vstv %s928_s13  ;;  %v100_v18 = vadd.f32 %v926_v33, %v95_v61 }
  0x24   :  { %v69_v14 = vmul.f32 0.16666667, %v66_v58  ;;  %v104_v15 = vmin.f32 %v101_v59, 6.0  ;;  %v102_v17 = vmax.f32 %v99_v60, 0.0  ;;  %71 = vst.msk [vmem:[%s1595_s2] sm:$0xff] %vm70_vm0, %v67_v62  ;;  %v129_v20 = vmul.f32 %v853_v3, %v966_v13 }
  0x25   :  { %72 = vst.msk [vmem:[%s1595_s2 + $0x8] sm:$0xff] %vm70_vm0, %v68_v63  ;;  %v124_v19 = vadd.f32 %v121_v10, %v116_v56  ;;  %v982_v21 = vstv %s940_s14  ;;  %v117_v22 = vmul.f32 %v948_v49, %v846_v2  ;;  %v103_v27 = vmax.f32 %v100_v18, 0.0 }
  0x26   :  { %74 = vst.msk [vmem:[%s1595_s2 + $0x10] sm:$0x3] %vm73_vm1, %v69_v14  ;;  %v107_v23 = vmul.f32 0.16666667, %v104_v15  ;;  %v105_v26 = vmin.f32 %v102_v17, 6.0  ;;  %v122_v28 = vmul.f32 %v858_v4, %v954_v57  ;;  %v130_v31 = vmul.f32 %v863_v5, %v966_v13 }
  0x27   :  { %v132_v30 = vadd.f32 %v129_v20, %v124_v19  ;;  %v118_v32 = vmul.f32 %v948_v49, %v872_v7  ;;  %v123_v34 = vmul.f32 %v877_v8, %v954_v57  ;;  %v106_v36 = vmin.f32 %v103_v27, 6.0 }
  0x28   :  { %690 = vst.msk [vmem:[%s1595_s2 + $0x18] sm:$0xff] %vm70_vm0, %v107_v23  ;;  %v108_v35 = vmul.f32 0.16666667, %v105_v26  ;;  %v125_v37 = vadd.f32 %v122_v28, %v117_v22  ;;  %v131_v38 = vmul.f32 %v882_v9, %v966_v13  ;;  %v1008_v41 = vstv %s956_s15 }
  0x29   :  { %v137_v39 = vadd.f32 %v982_v21, %v132_v30  ;;  %v126_v40 = vadd.f32 %v123_v34, %v118_v32  ;;  %v1011_v42 = vstv %s958_s16  ;;  %v109_v43 = vmul.f32 0.16666667, %v106_v36  ;;  %s1106_s16 = sld [smem:[#allocation2 + $0x300]] }
  0x2a   :  { %691 = vst.msk [vmem:[%s1595_s2 + $0x20] sm:$0xff] %vm70_vm0, %v108_v35  ;;  %v133_v44 = vadd.f32 %v130_v31, %v125_v37  ;;  %v155_v45 = vmul.f32 %v1008_v41, %v836_v0  ;;  %v160_v46 = vmul.f32 %v841_v1, %v1011_v42  ;;  %v1024_v50 = vstv %s961_s17 }
  0x2b   :  { %v140_v47 = vmax.f32 %v137_v39, 0.0  ;;  %v134_v48 = vadd.f32 %v131_v38, %v126_v40  ;;  %v1027_v51 = vstv %s968_s18  ;;  %692 = vst.msk [vmem:[%s1595_s2 + $0x28] sm:$0x3] %vm73_vm1, %v109_v43  ;;  %v168_v54 = vmul.f32 %v853_v3, %v1024_v50 }
  0x2c   :  { %v138_v52 = vadd.f32 %v982_v21, %v133_v44  ;;  %v163_v53 = vadd.f32 %v160_v46, %v155_v45  ;;  %v156_v55 = vmul.f32 %v1008_v41, %v846_v2  ;;  %v161_v59 = vmul.f32 %v858_v4, %v1011_v42 }
  0x2d   :  { %v143_v56 = vmin.f32 %v140_v47, 6.0  ;;  %v139_v58 = vadd.f32 %v982_v21, %v134_v48  ;;  %v169_v60 = vmul.f32 %v863_v5, %v1024_v50  ;;  %v157_v63 = vmul.f32 %v1008_v41, %v872_v7 }
  0x2e   :  { %v141_v61 = vmax.f32 %v138_v52, 0.0  ;;  %v171_v62 = vadd.f32 %v168_v54, %v163_v53  ;;  %v162_v10 = vmul.f32 %v877_v8, %v1011_v42  ;;  %v164_v17 = vadd.f32 %v161_v59, %v156_v55 }
  0x2f   :  { %v146_v14 = vmul.f32 0.16666667, %v143_v56  ;;  %v142_v15 = vmax.f32 %v139_v58, 0.0  ;;  %v170_v18 = vmul.f32 %v882_v9, %v1024_v50  ;;  %v1055_v23 = vstv %s1004_s26 }
  0x30   :  { %v144_v19 = vmin.f32 %v141_v61, 6.0  ;;  %v176_v20 = vadd.f32 %v1027_v51, %v171_v62  ;;  %v165_v22 = vadd.f32 %v162_v10, %v157_v63  ;;  %v172_v27 = vadd.f32 %v169_v60, %v164_v17 }
  0x31   :  { %697 = vst.msk [vmem:[%s1595_s2 + $0x30] sm:$0xff] %vm70_vm0, %v146_v14  ;;  %v145_v26 = vmin.f32 %v142_v15, 6.0  ;;  %v194_v28 = vmul.f32 %v1055_v23, %v836_v0  ;;  %v1068_v30 = vstv %s1013_s27  ;;  %v1076_v38 = vstv %s1029_s30 }
  0x32   :  { %v147_v31 = vmul.f32 0.16666667, %v144_v19  ;;  %v179_v32 = vmax.f32 %v176_v20, 0.0  ;;  %v173_v34 = vadd.f32 %v170_v18, %v165_v22  ;;  %v199_v35 = vmul.f32 %v841_v1, %v1068_v30 }
  0x33   :  { %v148_v36 = vmul.f32 0.16666667, %v145_v26  ;;  %v177_v37 = vadd.f32 %v1027_v51, %v172_v27  ;;  %v1079_v39 = vstv %s1031_s3  ;;  %v207_v45 = vmul.f32 %v853_v3, %v1076_v38 }
  0x34   :  { %698 = vst.msk [vmem:[%s1595_s2 + $0x38] sm:$0xff] %vm70_vm0, %v147_v31  ;;  %v182_v40 = vmin.f32 %v179_v32, 6.0  ;;  %v178_v43 = vadd.f32 %v1027_v51, %v173_v34  ;;  %v202_v44 = vadd.f32 %v199_v35, %v194_v28  ;;  %v195_v47 = vmul.f32 %v1055_v23, %v846_v2 }
  0x35   :  { %699 = vst.msk [vmem:[%s1595_s2 + $0x40] sm:$0x3] %vm73_vm1, %v148_v36  ;;  %v180_v46 = vmax.f32 %v177_v37, 0.0  ;;  %v200_v48 = vmul.f32 %v858_v4, %v1068_v30  ;;  %v208_v52 = vmul.f32 %v863_v5, %v1076_v38  ;;  %v196_v56 = vmul.f32 %v1055_v23, %v872_v7 }
  0x36   :  { %v185_v53 = vmul.f32 0.16666667, %v182_v40  ;;  %v181_v54 = vmax.f32 %v178_v43, 0.0  ;;  %v210_v55 = vadd.f32 %v207_v45, %v202_v44  ;;  %v201_v60 = vmul.f32 %v877_v8, %v1068_v30 }
  0x37   :  { %v183_v58 = vmin.f32 %v180_v46, 6.0  ;;  %v203_v59 = vadd.f32 %v200_v48, %v195_v47  ;;  %v209_v61 = vmul.f32 %v882_v9, %v1076_v38  ;;  %v1114_v10 = vstv %s1057_s6 }
  0x38   :  { %704 = vst.msk [vmem:[%s1595_s2 + $0x48] sm:$0xff] %vm70_vm0, %v185_v53  ;;  %v184_v62 = vmin.f32 %v181_v54, 6.0  ;;  %v215_v63 = vadd.f32 %v1079_v39, %v210_v55  ;;  %v1117_v14 = vstv %s1059_s7  ;;  %v204_v18 = vadd.f32 %v201_v60, %v196_v56 }
  0x39   :  { %v186_v15 = vmul.f32 0.16666667, %v183_v58  ;;  %v211_v17 = vadd.f32 %v208_v52, %v203_v59  ;;  %v233_v19 = vmul.f32 %v1114_v10, %v836_v0  ;;  %v238_v26 = vmul.f32 %v841_v1, %v1117_v14 }
  0x3a   :  { %v187_v20 = vmul.f32 0.16666667, %v184_v62  ;;  %v218_v22 = vmax.f32 %v215_v63, 0.0  ;;  %v1128_v27 = vstv %s1072_s10  ;;  %v212_v31 = vadd.f32 %v209_v61, %v204_v18 }
  0x3b   :  { %705 = vst.msk [vmem:[%s1595_s2 + $0x50] sm:$0xff] %vm70_vm0, %v186_v15  ;;  %v216_v28 = vadd.f32 %v1079_v39, %v211_v17  ;;  %v246_v32 = vmul.f32 %v853_v3, %v1128_v27  ;;  %v1138_v34 = vstv %s1081_s11  ;;  %v241_v36 = vadd.f32 %v238_v26, %v233_v19 }
  0x3c   :  { %706 = vst.msk [vmem:[%s1595_s2 + $0x58] sm:$0x3] %vm73_vm1, %v187_v20  ;;  %v221_v35 = vmin.f32 %v218_v22, 6.0  ;;  %v234_v37 = vmul.f32 %v1114_v10, %v846_v2  ;;  %v239_v40 = vmul.f32 %v858_v4, %v1117_v14  ;;  %v217_v44 = vadd.f32 %v1079_v39, %v212_v31 }
  0x3d   :  { %v219_v43 = vmax.f32 %v216_v28, 0.0  ;;  %v247_v45 = vmul.f32 %v863_v5, %v1128_v27  ;;  %v235_v46 = vmul.f32 %v1114_v10, %v872_v7  ;;  %v249_v48 = vadd.f32 %v246_v32, %v241_v36 }
  0x3e   :  { %v224_v47 = vmul.f32 0.16666667, %v221_v35  ;;  %v242_v52 = vadd.f32 %v239_v40, %v234_v37  ;;  %v240_v53 = vmul.f32 %v877_v8, %v1117_v14  ;;  %v220_v55 = vmax.f32 %v217_v44, 0.0 }
  0x3f   :  { %v222_v54 = vmin.f32 %v219_v43, 6.0  ;;  %v248_v56 = vmul.f32 %v882_v9, %v1128_v27  ;;  %v1160_v58 = vstv %s1106_s16  ;;  %v254_v59 = vadd.f32 %v1138_v34, %v249_v48 }
  0x40   :  { %711 = vst.msk [vmem:[%s1595_s2 + $0x60] sm:$0xff] %vm70_vm0, %v224_v47  ;;  %v250_v60 = vadd.f32 %v247_v45, %v242_v52  ;;  %v243_v61 = vadd.f32 %v240_v53, %v235_v46  ;;  %v272_v62 = vmul.f32 %v1160_v58, %v836_v0  ;;  %v223_v15 = vmin.f32 %v220_v55, 6.0 }
  0x41   :  { %v225_v63 = vmul.f32 0.16666667, %v222_v54  ;;  %v1174_v17 = vstv %s1121_s19  ;;  %v1177_v18 = vstv %s1123_s1  ;;  %v257_v19 = vmax.f32 %v254_v59, 0.0 }
  0x42   :  { %v255_v20 = vadd.f32 %v1138_v34, %v250_v60  ;;  %v251_v22 = vadd.f32 %v248_v56, %v243_v61  ;;  %v277_v26 = vmul.f32 %v841_v1, %v1174_v17  ;;  %v226_v28 = vmul.f32 0.16666667, %v223_v15 }
  0x43   :  { %712 = vst.msk [vmem:[%s1595_s2 + $0x68] sm:$0xff] %vm70_vm0, %v225_v63  ;;  %v285_v31 = vmul.f32 %v853_v3, %v1177_v18  ;;  %v1191_v32 = vstv %s1140_s22  ;;  %v273_v35 = vmul.f32 %v1160_v58, %v846_v2  ;;  %v260_v36 = vmin.f32 %v257_v19, 6.0 }
  0x44   :  { %v258_v37 = vmax.f32 %v255_v20, 0.0  ;;  %v256_v40 = vadd.f32 %v1138_v34, %v251_v22  ;;  %v280_v43 = vadd.f32 %v277_v26, %v272_v62  ;;  %713 = vst.msk [vmem:[%s1595_s2 + $0x70] sm:$0x3] %vm73_vm1, %v226_v28  ;;  %v278_v44 = vmul.f32 %v858_v4, %v1174_v17 }
  0x45   :  { %v286_v45 = vmul.f32 %v863_v5, %v1177_v18  ;;  %v274_v46 = vmul.f32 %v1160_v58, %v872_v7  ;;  %v279_v47 = vmul.f32 %v877_v8, %v1174_v17  ;;  %v263_v48 = vmul.f32 0.16666667, %v260_v36 }
  0x46   :  { %v261_v52 = vmin.f32 %v258_v37, 6.0  ;;  %v259_v53 = vmax.f32 %v256_v40, 0.0  ;;  %v288_v54 = vadd.f32 %v285_v31, %v280_v43  ;;  %v281_v55 = vadd.f32 %v278_v44, %v273_v35 }
  0x47   :  { %v282_v56 = vadd.f32 %v279_v47, %v274_v46  ;;  %v287_v59 = vmul.f32 %v882_v9, %v1177_v18  ;;  %v1213_v60 = vstv %s1162_s25  ;;  %718 = vst.msk [vmem:[%s1595_s2 + $0x78] sm:$0xff] %vm70_vm0, %v263_v48  ;;  %v1223_v22 = vstv %s1171_s28  ;;  %v1254_v46 = vld [vmem:[%s1593_s0 + $0x48] sm:$0xff] }
  0x48   :  { %v264_v61 = vmul.f32 0.16666667, %v261_v52  ;;  %v262_v62 = vmin.f32 %v259_v53, 6.0  ;;  %v293_v63 = vadd.f32 %v1191_v32, %v288_v54  ;;  %v311_v15 = vmul.f32 %v1213_v60, %v836_v0 }
  0x49   :  { %v289_v19 = vadd.f32 %v286_v45, %v281_v55  ;;  %v290_v20 = vadd.f32 %v287_v59, %v282_v56  ;;  %v1226_v26 = vstv %s1179_s29  ;;  %v316_v35 = vmul.f32 %v841_v1, %v1223_v22 }
  0x4a   :  { %719 = vst.msk [vmem:[%s1595_s2 + $0x80] sm:$0xff] %vm70_vm0, %v264_v61  ;;  %v265_v28 = vmul.f32 0.16666667, %v262_v62  ;;  %v296_v31 = vmax.f32 %v293_v63, 0.0  ;;  %v324_v36 = vmul.f32 %v853_v3, %v1226_v26  ;;  %v1239_v40 = vstv %s1195_s4  ;;  %v1282_v63 = vld [vmem:[%s1593_s0 + $0x68] sm:$0xff] }
  0x4b   :  { %v294_v0 = vadd.f32 %v1191_v32, %v289_v19  ;;  %v295_v37 = vadd.f32 %v1191_v32, %v290_v20  ;;  %v312_v43 = vmul.f32 %v1213_v60, %v846_v2  ;;  %v319_v45 = vadd.f32 %v316_v35, %v311_v15  ;;  %v1306_v35 = vld [vmem:[%s1593_s0 + $0x70] sm:$0x3] }
  0x4c   :  { %720 = vst.msk [vmem:[%s1595_s2 + $0x88] sm:$0x3] %vm73_vm1, %v265_v28  ;;  %v299_v44 = vmin.f32 %v296_v31, 6.0  ;;  %v317_v1 = vmul.f32 %v858_v4, %v1223_v22  ;;  %v325_v3 = vmul.f32 %v863_v5, %v1226_v26  ;;  %v313_v48 = vmul.f32 %v1213_v60, %v872_v7  ;;  %v1263_v4 = vld [vmem:[%s1593_s0 + $0x60] sm:$0xff]  ;;  %v1268_v5 = vld [vmem:[%s1593_s0 + $0x78] sm:$0xff]  ;;  %v1275_v7 = vld [vmem:[%s1593_s0 + $0x50] sm:$0xff] }
  0x4d   :  { %v297_v47 = vmax.f32 %v294_v0, 0.0  ;;  %v298_v2 = vmax.f32 %v295_v37, 0.0  ;;  %v318_v52 = vmul.f32 %v877_v8, %v1223_v22  ;;  %v327_v54 = vadd.f32 %v324_v36, %v319_v45  ;;  %v1296_v28 = vld [vmem:[%s1593_s0 + $0x80] sm:$0xff]  ;;  %v1301_v31 = vld [vmem:[%s1593_s0 + $0x58] sm:$0x3] }
  0x4e   :  { %v302_v53 = vmul.f32 0.16666667, %v299_v44  ;;  %v320_v55 = vadd.f32 %v317_v1, %v312_v43  ;;  %v326_v56 = vmul.f32 %v882_v9, %v1226_v26  ;;  %v362_v62 = vmul.f32 %v1254_v46, %v867_v6 }
  0x4f   :  { %v300_v8 = vmin.f32 %v297_v47, 6.0  ;;  %v301_v59 = vmin.f32 %v298_v2, 6.0  ;;  %v321_v61 = vadd.f32 %v318_v52, %v313_v48  ;;  %v332_v9 = vadd.f32 %v1239_v40, %v327_v54  ;;  %v1316_v47 = vld [vmem:[%s1593_s0 + $0x88] sm:$0x3] }
  0x50   :  { %725 = vst.msk [vmem:[%s1595_s2 + $0x90] sm:$0xff] %vm70_vm0, %v302_v53  ;;  %v328_v15 = vadd.f32 %v325_v3, %v320_v55  ;;  %v367_v19 = vmul.f32 %v1263_v4, %v886_v11  ;;  %v375_v20 = vmul.f32 %v1268_v5, %v888_v12  ;;  %v363_v43 = vmul.f32 %v1275_v7, %v867_v6 }
  0x51   :  { %v303_v36 = vmul.f32 0.16666667, %v300_v8  ;;  %v304_v0 = vmul.f32 0.16666667, %v301_v59  ;;  %v329_v37 = vadd.f32 %v326_v56, %v321_v61  ;;  %v335_v44 = vmax.f32 %v332_v9, 0.0 }
  0x52   :  { %v333_v45 = vadd.f32 %v1239_v40, %v328_v15  ;;  %v370_v1 = vadd.f32 %v367_v19, %v362_v62  ;;  %v368_v3 = vmul.f32 %v1282_v63, %v886_v11  ;;  %v376_v48 = vmul.f32 %v1296_v28, %v888_v12 }
  0x53   :  { %726 = vst.msk [vmem:[%s1595_s2 + $0x98] sm:$0xff] %vm70_vm0, %v303_v36  ;;  %v334_v2 = vadd.f32 %v1239_v40, %v329_v37  ;;  %v364_v52 = vmul.f32 %v1301_v31, %v867_v6  ;;  %v369_v53 = vmul.f32 %v1306_v35, %v886_v11  ;;  %v338_v54 = vmin.f32 %v335_v44, 6.0 }
  0x54   :  { %727 = vst.msk [vmem:[%s1595_s2 + $0xa0] sm:$0x3] %vm73_vm1, %v304_v0  ;;  %v336_v55 = vmax.f32 %v333_v45, 0.0  ;;  %v378_v56 = vadd.f32 %v375_v20, %v370_v1  ;;  %v371_v8 = vadd.f32 %v368_v3, %v363_v43  ;;  %v377_v62 = vmul.f32 %v1316_v47, %v888_v12 }
  0x55   :  { %v337_v59 = vmax.f32 %v334_v2, 0.0  ;;  %v372_v61 = vadd.f32 %v369_v53, %v364_v52  ;;  %v401_v9 = vmul.f32 %v1254_v46, %v910_v24  ;;  %v341_v15 = vmul.f32 0.16666667, %v338_v54 }
  0x56   :  { %v339_v19 = vmin.f32 %v336_v55, 6.0  ;;  %v383_v36 = vadd.f32 %v378_v56, %v896_v16  ;;  %v379_v6 = vadd.f32 %v376_v48, %v371_v8  ;;  %v406_v11 = vmul.f32 %v1263_v4, %v912_v25 }
  0x57   :  { %v340_v0 = vmin.f32 %v337_v59, 6.0  ;;  %v380_v37 = vadd.f32 %v377_v62, %v372_v61  ;;  %v414_v20 = vmul.f32 %v1268_v5, %v921_v29  ;;  %732 = vst.msk [vmem:[%s1595_s2 + $0xa8] sm:$0xff] %vm70_vm0, %v341_v15  ;;  %v402_v45 = vmul.f32 %v1275_v7, %v910_v24 }
  0x58   :  { %v342_v12 = vmul.f32 0.16666667, %v339_v19  ;;  %v386_v43 = vmax.f32 %v383_v36, 0.0  ;;  %v384_v44 = vadd.f32 %v379_v6, %v896_v16  ;;  %v409_v2 = vadd.f32 %v406_v11, %v401_v9 }
  0x59   :  { %v343_v1 = vmul.f32 0.16666667, %v340_v0  ;;  %v385_v3 = vadd.f32 %v380_v37, %v896_v16  ;;  %v407_v48 = vmul.f32 %v1282_v63, %v912_v25  ;;  %v415_v54 = vmul.f32 %v1296_v28, %v921_v29 }
  0x5a   :  { %733 = vst.msk [vmem:[%s1595_s2 + $0xb0] sm:$0xff] %vm70_vm0, %v342_v12  ;;  %v389_v52 = vmin.f32 %v386_v43, 6.0  ;;  %v387_v53 = vmax.f32 %v384_v44, 0.0  ;;  %v403_v55 = vmul.f32 %v1301_v31, %v910_v24  ;;  %v417_v56 = vadd.f32 %v414_v20, %v409_v2 }
  0x5b   :  { %734 = vst.msk [vmem:[%s1595_s2 + $0xb8] sm:$0x3] %vm73_vm1, %v343_v1  ;;  %v388_v16 = vmax.f32 %v385_v3, 0.0  ;;  %v410_v8 = vadd.f32 %v407_v48, %v402_v45  ;;  %v408_v59 = vmul.f32 %v1306_v35, %v912_v25  ;;  %v416_v9 = vmul.f32 %v1316_v47, %v921_v29 }
  0x5c   :  { %v392_v61 = vmul.f32 0.16666667, %v389_v52  ;;  %v390_v62 = vmin.f32 %v387_v53, 6.0  ;;  %v440_v15 = vmul.f32 %v1254_v46, %v948_v49  ;;  %v422_v19 = vadd.f32 %v417_v56, %v926_v33 }
  0x5d   :  { %v391_v24 = vmin.f32 %v388_v16, 6.0  ;;  %v418_v36 = vadd.f32 %v415_v54, %v410_v8  ;;  %v411_v6 = vadd.f32 %v408_v59, %v403_v55  ;;  %v445_v25 = vmul.f32 %v1263_v4, %v954_v57 }
  0x5e   :  { %747 = vst.msk [vmem:[%s1595_s2 + $0xc0] sm:$0xff] %vm70_vm0, %v392_v61  ;;  %v393_v0 = vmul.f32 0.16666667, %v390_v62  ;;  %v453_v29 = vmul.f32 %v1268_v5, %v966_v13  ;;  %v441_v37 = vmul.f32 %v1275_v7, %v948_v49  ;;  %v425_v20 = vmax.f32 %v422_v19, 0.0 }
  0x5f   :  { %v394_v11 = vmul.f32 0.16666667, %v391_v24  ;;  %v423_v12 = vadd.f32 %v418_v36, %v926_v33  ;;  %v419_v43 = vadd.f32 %v416_v9, %v411_v6  ;;  %v448_v44 = vadd.f32 %v445_v25, %v440_v15 }
  0x60   :  { %748 = vst.msk [vmem:[%s1595_s2 + $0xc8] sm:$0xff] %vm70_vm0, %v393_v0  ;;  %v446_v45 = vmul.f32 %v1282_v63, %v954_v57  ;;  %v454_v1 = vmul.f32 %v1296_v28, %v966_v13  ;;  %v442_v3 = vmul.f32 %v1301_v31, %v948_v49  ;;  %v428_v2 = vmin.f32 %v425_v20, 6.0 }
  0x61   :  { %749 = vst.msk [vmem:[%s1595_s2 + $0xd0] sm:$0x3] %vm73_vm1, %v394_v11  ;;  %v426_v48 = vmax.f32 %v423_v12, 0.0  ;;  %v424_v52 = vadd.f32 %v419_v43, %v926_v33  ;;  %v447_v53 = vmul.f32 %v1306_v35, %v954_v57  ;;  %v456_v54 = vadd.f32 %v453_v29, %v448_v44 }
  0x62   :  { %v449_v55 = vadd.f32 %v446_v45, %v441_v37  ;;  %v455_v16 = vmul.f32 %v1316_v47, %v966_v13  ;;  %v479_v49 = vmul.f32 %v1254_v46, %v1008_v41  ;;  %v431_v56 = vmul.f32 0.16666667, %v428_v2 }
  0x63   :  { %v429_v8 = vmin.f32 %v426_v48, 6.0  ;;  %v427_v59 = vmax.f32 %v424_v52, 0.0  ;;  %v450_v61 = vadd.f32 %v447_v53, %v442_v3  ;;  %v461_v62 = vadd.f32 %v456_v54, %v982_v21 }
  0x64   :  { %v457_v9 = vadd.f32 %v454_v1, %v449_v55  ;;  %v484_v33 = vmul.f32 %v1263_v4, %v1011_v42  ;;  %v492_v57 = vmul.f32 %v1268_v5, %v1024_v50  ;;  %754 = vst.msk [vmem:[%s1595_s2 + $0xd8] sm:$0xff] %vm70_vm0, %v431_v56  ;;  %v480_v19 = vmul.f32 %v1275_v7, %v1008_v41 }
  0x65   :  { %v432_v13 = vmul.f32 0.16666667, %v429_v8  ;;  %v430_v15 = vmin.f32 %v427_v59, 6.0  ;;  %v458_v24 = vadd.f32 %v455_v16, %v450_v61  ;;  %v464_v36 = vmax.f32 %v461_v62, 0.0 }
  0x66   :  { %v462_v6 = vadd.f32 %v457_v9, %v982_v21  ;;  %v487_v0 = vadd.f32 %v484_v33, %v479_v49  ;;  %v485_v25 = vmul.f32 %v1282_v63, %v1011_v42  ;;  %v493_v11 = vmul.f32 %v1296_v28, %v1024_v50 }
  0x67   :  { %755 = vst.msk [vmem:[%s1595_s2 + $0xe0] sm:$0xff] %vm70_vm0, %v432_v13  ;;  %v433_v29 = vmul.f32 0.16666667, %v430_v15  ;;  %v463_v37 = vadd.f32 %v458_v24, %v982_v21  ;;  %v481_v20 = vmul.f32 %v1301_v31, %v1008_v41  ;;  %v467_v12 = vmin.f32 %v464_v36, 6.0 }
  0x68   :  { %v465_v43 = vmax.f32 %v462_v6, 0.0  ;;  %v495_v44 = vadd.f32 %v492_v57, %v487_v0  ;;  %v488_v45 = vadd.f32 %v485_v25, %v480_v19  ;;  %v486_v3 = vmul.f32 %v1306_v35, %v1011_v42 }
  0x69   :  { %756 = vst.msk [vmem:[%s1595_s2 + $0xe8] sm:$0x3] %vm73_vm1, %v433_v29  ;;  %v466_v1 = vmax.f32 %v463_v37, 0.0  ;;  %v494_v21 = vmul.f32 %v1316_v47, %v1024_v50  ;;  %v518_v2 = vmul.f32 %v1254_v46, %v1055_v23  ;;  %v470_v41 = vmul.f32 0.16666667, %v467_v12 }
  0x6a   :  { %v468_v48 = vmin.f32 %v465_v43, 6.0  ;;  %v500_v52 = vadd.f32 %v495_v44, %v1027_v51  ;;  %v496_v53 = vadd.f32 %v493_v11, %v488_v45  ;;  %v489_v55 = vadd.f32 %v486_v3, %v481_v20 }
  0x6b   :  { %v469_v54 = vmin.f32 %v466_v1, 6.0  ;;  %v523_v16 = vmul.f32 %v1263_v4, %v1068_v30  ;;  %v531_v49 = vmul.f32 %v1268_v5, %v1076_v38  ;;  %761 = vst.msk [vmem:[%s1595_s2 + $0xf0] sm:$0xff] %vm70_vm0, %v470_v41  ;;  %v519_v8 = vmul.f32 %v1275_v7, %v1055_v23 }
  0x6c   :  { %v471_v42 = vmul.f32 0.16666667, %v468_v48  ;;  %v503_v50 = vmax.f32 %v500_v52, 0.0  ;;  %v501_v56 = vadd.f32 %v496_v53, %v1027_v51  ;;  %v497_v61 = vadd.f32 %v494_v21, %v489_v55 }
  0x6d   :  { %v472_v59 = vmul.f32 0.16666667, %v469_v54  ;;  %v526_v62 = vadd.f32 %v523_v16, %v518_v2  ;;  %v524_v9 = vmul.f32 %v1282_v63, %v1068_v30  ;;  %v532_v13 = vmul.f32 %v1296_v28, %v1076_v38 }
  0x6e   :  { %762 = vst.msk [vmem:[%s1595_s2 + $0xf8] sm:$0xff] %vm70_vm0, %v471_v42  ;;  %v506_v33 = vmin.f32 %v503_v50, 6.0  ;;  %v504_v57 = vmax.f32 %v501_v56, 0.0  ;;  %v520_v15 = vmul.f32 %v1301_v31, %v1055_v23  ;;  %v502_v24 = vadd.f32 %v497_v61, %v1027_v51 }
  0x6f   :  { %763 = vst.msk [vmem:[%s1595_s2 + $0x100] sm:$0x3] %vm73_vm1, %v472_v59  ;;  %v534_v19 = vadd.f32 %v531_v49, %v526_v62  ;;  %v527_v36 = vadd.f32 %v524_v9, %v519_v8  ;;  %v525_v6 = vmul.f32 %v1306_v35, %v1068_v30  ;;  %v533_v29 = vmul.f32 %v1316_v47, %v1076_v38 }
  0x70   :  { %v509_v0 = vmul.f32 0.16666667, %v506_v33  ;;  %v507_v25 = vmin.f32 %v504_v57, 6.0  ;;  %v557_v23 = vmul.f32 %v1254_v46, %v1114_v10  ;;  %v505_v37 = vmax.f32 %v502_v24, 0.0 }
  0x71   :  { %v539_v11 = vadd.f32 %v534_v19, %v1079_v39  ;;  %v535_v20 = vadd.f32 %v532_v13, %v527_v36  ;;  %v528_v12 = vadd.f32 %v525_v6, %v520_v15  ;;  %v562_v30 = vmul.f32 %v1263_v4, %v1117_v14 }
  0x72   :  { %768 = vst.msk [vmem:[%s1595_s2 + $0x108] sm:$0xff] %vm70_vm0, %v509_v0  ;;  %v510_v51 = vmul.f32 0.16666667, %v507_v25  ;;  %v570_v38 = vmul.f32 %v1268_v5, %v1128_v27  ;;  %v558_v43 = vmul.f32 %v1275_v7, %v1114_v10  ;;  %v508_v44 = vmin.f32 %v505_v37, 6.0 }
  0x73   :  { %v542_v45 = vmax.f32 %v539_v11, 0.0  ;;  %v540_v1 = vadd.f32 %v535_v20, %v1079_v39  ;;  %v536_v3 = vadd.f32 %v533_v29, %v528_v12  ;;  %v565_v21 = vadd.f32 %v562_v30, %v557_v23 }
  0x74   :  { %769 = vst.msk [vmem:[%s1595_s2 + $0x110] sm:$0xff] %vm70_vm0, %v510_v51  ;;  %v563_v2 = vmul.f32 %v1282_v63, %v1117_v14  ;;  %v571_v41 = vmul.f32 %v1296_v28, %v1128_v27  ;;  %v559_v48 = vmul.f32 %v1301_v31, %v1114_v10  ;;  %v511_v52 = vmul.f32 0.16666667, %v508_v44 }
  0x75   :  { %v545_v53 = vmin.f32 %v542_v45, 6.0  ;;  %v543_v54 = vmax.f32 %v540_v1, 0.0  ;;  %v541_v55 = vadd.f32 %v536_v3, %v1079_v39  ;;  %v573_v16 = vadd.f32 %v570_v38, %v565_v21 }
  0x76   :  { %v566_v49 = vadd.f32 %v563_v2, %v558_v43  ;;  %v564_v42 = vmul.f32 %v1306_v35, %v1117_v14  ;;  %v572_v50 = vmul.f32 %v1316_v47, %v1128_v27  ;;  %770 = vst.msk [vmem:[%s1595_s2 + $0x118] sm:$0x3] %vm73_vm1, %v511_v52  ;;  %v596_v59 = vmul.f32 %v1254_v46, %v1160_v58 }
  0x77   :  { %v548_v56 = vmul.f32 0.16666667, %v545_v53  ;;  %v546_v10 = vmin.f32 %v543_v54, 6.0  ;;  %v544_v8 = vmax.f32 %v541_v55, 0.0  ;;  %v578_v39 = vadd.f32 %v573_v16, %v1138_v34 }
  0x78   :  { %v574_v61 = vadd.f32 %v571_v41, %v566_v49  ;;  %v567_v62 = vadd.f32 %v564_v42, %v559_v48  ;;  %v601_v14 = vmul.f32 %v1263_v4, %v1174_v17  ;;  %v609_v33 = vmul.f32 %v1268_v5, %v1177_v18 }
  0x79   :  { %775 = vst.msk [vmem:[%s1595_s2 + $0x120] sm:$0xff] %vm70_vm0, %v548_v56  ;;  %v549_v27 = vmul.f32 0.16666667, %v546_v10  ;;  %v547_v9 = vmin.f32 %v544_v8, 6.0  ;;  %v597_v57 = vmul.f32 %v1275_v7, %v1160_v58  ;;  %v581_v13 = vmax.f32 %v578_v39, 0.0 }
  0x7a   :  { %v579_v15 = vadd.f32 %v574_v61, %v1138_v34  ;;  %v575_v24 = vadd.f32 %v572_v50, %v567_v62  ;;  %v604_v19 = vadd.f32 %v601_v14, %v596_v59  ;;  %v602_v6 = vmul.f32 %v1282_v63, %v1174_v17 }
  0x7b   :  { %776 = vst.msk [vmem:[%s1595_s2 + $0x128] sm:$0xff] %vm70_vm0, %v549_v27  ;;  %v550_v36 = vmul.f32 0.16666667, %v547_v9  ;;  %v610_v0 = vmul.f32 %v1296_v28, %v1177_v18  ;;  %v598_v25 = vmul.f32 %v1301_v31, %v1160_v58  ;;  %v584_v29 = vmin.f32 %v581_v13, 6.0 }
  0x7c   :  { %v582_v23 = vmax.f32 %v579_v15, 0.0  ;;  %v580_v37 = vadd.f32 %v575_v24, %v1138_v34  ;;  %v612_v11 = vadd.f32 %v609_v33, %v604_v19  ;;  %v605_v20 = vadd.f32 %v602_v6, %v597_v57 }
  0x7d   :  { %777 = vst.msk [vmem:[%s1595_s2 + $0x130] sm:$0x3] %vm73_vm1, %v550_v36  ;;  %v603_v12 = vmul.f32 %v1306_v35, %v1174_v17  ;;  %v611_v51 = vmul.f32 %v1316_v47, %v1177_v18  ;;  %v635_v58 = vmul.f32 %v1254_v46, %v1213_v60  ;;  %v587_v30 = vmul.f32 0.16666667, %v584_v29 }
  0x7e   :  { %v585_v38 = vmin.f32 %v582_v23, 6.0  ;;  %v583_v43 = vmax.f32 %v580_v37, 0.0  ;;  %v617_v34 = vadd.f32 %v612_v11, %v1191_v32  ;;  %v613_v44 = vadd.f32 %v610_v0, %v605_v20 }
  0x7f   :  { %v606_v45 = vadd.f32 %v603_v12, %v598_v25  ;;  %v640_v1 = vmul.f32 %v1263_v4, %v1223_v22  ;;  %v648_v3 = vmul.f32 %v1268_v5, %v1226_v26  ;;  %782 = vst.msk [vmem:[%s1595_s2 + $0x138] sm:$0xff] %vm70_vm0, %v587_v30  ;;  %v636_v21 = vmul.f32 %v1275_v7, %v1213_v60 }
  0x80   :  { %v588_v17 = vmul.f32 0.16666667, %v585_v38  ;;  %v586_v18 = vmin.f32 %v583_v43, 6.0  ;;  %v620_v46 = vmax.f32 %v617_v34, 0.0  ;;  %v618_v2 = vadd.f32 %v613_v44, %v1191_v32 }
  0x81   :  { %v614_v41 = vadd.f32 %v611_v51, %v606_v45  ;;  %v643_v48 = vadd.f32 %v640_v1, %v635_v58  ;;  %v641_v4 = vmul.f32 %v1282_v63, %v1223_v22  ;;  %v649_v53 = vmul.f32 %v1296_v28, %v1226_v26 }
  0x82   :  { %783 = vst.msk [vmem:[%s1595_s2 + $0x140] sm:$0xff] %vm70_vm0, %v588_v17  ;;  %v589_v5 = vmul.f32 0.16666667, %v586_v18  ;;  %v623_v52 = vmin.f32 %v620_v46, 6.0  ;;  %v637_v7 = vmul.f32 %v1301_v31, %v1213_v60  ;;  %v621_v54 = vmax.f32 %v618_v2, 0.0 }
  0x83   :  { %v619_v55 = vadd.f32 %v614_v41, %v1191_v32  ;;  %v651_v16 = vadd.f32 %v648_v3, %v643_v48  ;;  %v644_v49 = vadd.f32 %v641_v4, %v636_v21  ;;  %v642_v42 = vmul.f32 %v1306_v35, %v1223_v22 }
  0x84   :  { %784 = vst.msk [vmem:[%s1595_s2 + $0x148] sm:$0x3] %vm73_vm1, %v589_v5  ;;  %v626_v63 = vmul.f32 0.16666667, %v623_v52  ;;  %v650_v28 = vmul.f32 %v1316_v47, %v1226_v26  ;;  %v624_v50 = vmin.f32 %v621_v54, 6.0 }
  0x85   :  { %v622_v56 = vmax.f32 %v619_v55, 0.0  ;;  %v656_v60 = vadd.f32 %v651_v16, %v1239_v40  ;;  %v652_v31 = vadd.f32 %v649_v53, %v644_v49  ;;  %v645_v32 = vadd.f32 %v642_v42, %v637_v7 }
  0x86   :  { %789 = vst.msk [vmem:[%s1595_s2 + $0x150] sm:$0xff] %vm70_vm0, %v626_v63  ;;  %v627_v10 = vmul.f32 0.16666667, %v624_v50 }
  0x87   :  { %v625_v8 = vmin.f32 %v622_v56, 6.0  ;;  %v659_v59 = vmax.f32 %v656_v60, 0.0  ;;  %v657_v39 = vadd.f32 %v652_v31, %v1239_v40  ;;  %v653_v22 = vadd.f32 %v650_v28, %v645_v32 }
  0x88   :  { %790 = vst.msk [vmem:[%s1595_s2 + $0x158] sm:$0xff] %vm70_vm0, %v627_v10 }
  0x89   :  { %v628_v26 = vmul.f32 0.16666667, %v625_v8  ;;  %v662_v35 = vmin.f32 %v659_v59, 6.0  ;;  %v660_v47 = vmax.f32 %v657_v39, 0.0  ;;  %v658_v61 = vadd.f32 %v653_v22, %v1239_v40 }
  0x8b   :  { %791 = vst.msk [vmem:[%s1595_s2 + $0x160] sm:$0x3] %vm73_vm1, %v628_v26  ;;  %v665_v62 = vmul.f32 0.16666667, %v662_v35  ;;  %v663_v14 = vmin.f32 %v660_v47, 6.0  ;;  %v661_v27 = vmax.f32 %v658_v61, 0.0 }
  0x8d   :  { %796 = vst.msk [vmem:[%s1595_s2 + $0x168] sm:$0xff] %vm70_vm0, %v665_v62  ;;  %v666_v9 = vmul.f32 0.16666667, %v663_v14  ;;  %v664_v33 = vmin.f32 %v661_v27, 6.0 }
  0x8f   :  { %797 = vst.msk [vmem:[%s1595_s2 + $0x170] sm:$0xff] %vm70_vm0, %v666_v9  ;;  %v667_v40 = vmul.f32 0.16666667, %v664_v33 }
  0x91   :  { %798 = vst.msk [vmem:[%s1595_s2 + $0x178] sm:$0x3] %vm73_vm1, %v667_v40 }
  0x92   :  { %676 = vsyncpa [#allocation3], 1 }

</bundles_post_ra>
